<compile_context>
chip_gen: v6e
topology: v6e:2x2x1
jax: 0.10.0
libtpu: 0.0.40
codegen_flags: <defaults>
</compile_context>

<pallas_src>
import jax
import jax.numpy as jnp
from jax import lax
from jax.experimental import pallas as pl
from jax.experimental.pallas import tpu as pltpu

HIDDEN = 128          # hidden_size
NUM_HEADS = 2
HEAD_DIM = HIDDEN // NUM_HEADS          # 64
FFN = 4 * HIDDEN      # BERT intermediate size
LN_EPS = 1e-12        # BERT LayerNorm epsilon
TILE = 16             # sequence tile (multiple of 16 -> bf16-friendly blocks)
SCALE = 1.0 / (HEAD_DIM ** 0.5)


def _layer_norm(x, g, b):
    mu = jnp.mean(x, axis=-1, keepdims=True)
    xc = x - mu
    var = jnp.mean(xc * xc, axis=-1, keepdims=True)
    return xc * lax.rsqrt(var + LN_EPS) * g + b


# --------------------------------------------------------------------------
# Kernel A: fused QKV projection, gridded ("parallel") over sequence tiles.
# q is pre-scaled by 1/sqrt(head_dim); q/k/v are emitted in bf16 so they are
# ready to be MXU operands in kernel B.
# --------------------------------------------------------------------------
def qkv_kernel(x_ref, wqkv_ref, bqkv_ref, q_ref, k_ref, v_ref):
    x = x_ref[...].astype(jnp.bfloat16)                       # (TILE, H)
    qkv = jnp.dot(x, wqkv_ref[...],
                  preferred_element_type=jnp.float32)          # (TILE, 3H) f32
    qkv = qkv + bqkv_ref[...]
    q = qkv[:, 0:HIDDEN] * SCALE                               # fold 1/sqrt(dh)
    k = qkv[:, HIDDEN:2 * HIDDEN]
    v = qkv[:, 2 * HIDDEN:3 * HIDDEN]
    q_ref[...] = q.astype(jnp.bfloat16)
    k_ref[...] = k.astype(jnp.bfloat16)
    v_ref[...] = v.astype(jnp.bfloat16)


# --------------------------------------------------------------------------
# Kernel B: per query tile -> multi-head attention + output dense + LN +
# GELU MLP + LN.  K/V/mask/weights are full-resident (constant block index).
# --------------------------------------------------------------------------
def attn_ffn_kernel(x_ref, q_ref, k_ref, v_ref, mask_ref,
                    wo_ref, bo_ref, g1_ref, be1_ref,
                    wi_ref, bi_ref, w2_ref, b2_ref, g2_ref, be2_ref,
                    out_ref):
    x = x_ref[...]                                             # (TILE, H) f32
    q = q_ref[...]                                             # (TILE, H) bf16 (scaled)
    K = k_ref[...]                                             # (S, H) bf16
    V = v_ref[...]                                             # (S, H) bf16
    mask = mask_ref[...]                                       # (1, S) f32 additive

    ctx_heads = []
    for h in range(NUM_HEADS):                                 # static unroll
        sl = slice(h * HEAD_DIM, (h + 1) * HEAD_DIM)
        qh = q[:, sl]                                          # (TILE, dh)
        kh = K[:, sl]                                          # (S, dh)
        vh = V[:, sl]                                          # (S, dh)
        scores = lax.dot_general(qh, kh, (((1,), (1,)), ((), ())),
                                 preferred_element_type=jnp.float32)  # (TILE, S)
        scores = scores + mask                                 # key-wise broadcast
        m = jnp.max(scores, axis=-1, keepdims=True)
        p = jnp.exp(scores - m)
        denom = jnp.sum(p, axis=-1, keepdims=True)
        probs = p * pl.reciprocal(denom, approx=True)
        ctx_heads.append(jnp.dot(probs.astype(jnp.bfloat16), vh,
                                 preferred_element_type=jnp.float32))  # (TILE, dh)
    ctx = jnp.concatenate(ctx_heads, axis=-1)                  # (TILE, H) f32

    # attention output dense + residual + LayerNorm
    attn_out = jnp.dot(ctx.astype(jnp.bfloat16), wo_ref[...],
                       preferred_element_type=jnp.float32) + bo_ref[...]
    h1 = _layer_norm(attn_out + x, g1_ref[...], be1_ref[...])

    # feed-forward: intermediate dense -> GELU -> output dense + residual + LN
    inter = jnp.dot(h1.astype(jnp.bfloat16), wi_ref[...],
                    preferred_element_type=jnp.float32) + bi_ref[...]
    # TODO(synk): BERT/BGE uses erf-based GELU; tanh approximation used here.
    inter = jax.nn.gelu(inter, approximate=True)
    mlp = jnp.dot(inter.astype(jnp.bfloat16), w2_ref[...],
                  preferred_element_type=jnp.float32) + b2_ref[...]
    out_ref[...] = _layer_norm(mlp + h1, g2_ref[...], be2_ref[...])


@jax.jit
def bge_block_forward(hidden_states, attention_mask, params):
    """hidden_states: (1, S, H) f32; attention_mask: (1, 1, 1, S) additive f32."""
    x2d = hidden_states.reshape(-1, HIDDEN).astype(jnp.float32)   # batch=1 layout
    S = x2d.shape[0]
    assert S % TILE == 0, "sequence length must be a multiple of TILE"
    n_tiles = S // TILE
    mask_row = attention_mask.reshape(1, S).astype(jnp.float32)   # (1, S)

    parallel = pltpu.CompilerParams(dimension_semantics=("parallel",))

    # ---- kernel A: fused QKV projection --------------------------------
    q, k, v = pl.pallas_call(
        qkv_kernel,
        out_shape=(jax.ShapeDtypeStruct((S, HIDDEN), jnp.bfloat16),
                   jax.ShapeDtypeStruct((S, HIDDEN), jnp.bfloat16),
                   jax.ShapeDtypeStruct((S, HIDDEN), jnp.bfloat16)),
        grid=(n_tiles,),
        in_specs=[
            pl.BlockSpec((TILE, HIDDEN), lambda i: (i, 0)),
            pl.BlockSpec((HIDDEN, 3 * HIDDEN), lambda i: (0, 0)),
            pl.BlockSpec((1, 3 * HIDDEN), lambda i: (0, 0)),
        ],
        out_specs=(
            pl.BlockSpec((TILE, HIDDEN), lambda i: (i, 0)),
            pl.BlockSpec((TILE, HIDDEN), lambda i: (i, 0)),
            pl.BlockSpec((TILE, HIDDEN), lambda i: (i, 0)),
        ),
        compiler_params=parallel,
    )(x2d, params["w_qkv"], params["b_qkv"])

    # ---- kernel B: attention + FFN per query tile -----------------------
    out2d = pl.pallas_call(
        attn_ffn_kernel,
        out_shape=jax.ShapeDtypeStruct((S, HIDDEN), jnp.float32),
        grid=(n_tiles,),
        in_specs=[
            pl.BlockSpec((TILE, HIDDEN), lambda i: (i, 0)),    # x (residual)
            pl.BlockSpec((TILE, HIDDEN), lambda i: (i, 0)),    # q tile
            pl.BlockSpec((S, HIDDEN), lambda i: (0, 0)),       # K (full)
            pl.BlockSpec((S, HIDDEN), lambda i: (0, 0)),       # V (full)
            pl.BlockSpec((1, S), lambda i: (0, 0)),            # additive mask row
            pl.BlockSpec((HIDDEN, HIDDEN), lambda i: (0, 0)),  # Wo
            pl.BlockSpec((1, HIDDEN), lambda i: (0, 0)),       # bo
            pl.BlockSpec((1, HIDDEN), lambda i: (0, 0)),       # ln1 gamma
            pl.BlockSpec((1, HIDDEN), lambda i: (0, 0)),       # ln1 beta
            pl.BlockSpec((HIDDEN, FFN), lambda i: (0, 0)),     # W_intermediate
            pl.BlockSpec((1, FFN), lambda i: (0, 0)),          # b_intermediate
            pl.BlockSpec((FFN, HIDDEN), lambda i: (0, 0)),     # W_output
            pl.BlockSpec((1, HIDDEN), lambda i: (0, 0)),       # b_output
            pl.BlockSpec((1, HIDDEN), lambda i: (0, 0)),       # ln2 gamma
            pl.BlockSpec((1, HIDDEN), lambda i: (0, 0)),       # ln2 beta
        ],
        out_specs=pl.BlockSpec((TILE, HIDDEN), lambda i: (i, 0)),
        compiler_params=parallel,
    )(x2d, q, k, v, mask_row,
      params["w_o"], params["b_o"], params["ln1_g"], params["ln1_b"],
      params["w_i"], params["b_i"], params["w_out"], params["b_out"],
      params["ln2_g"], params["ln2_b"])

    return out2d.reshape(1, S, HIDDEN)


# --------------------------------------------------------------------------
# Pure-JAX reference (same math, all f32, exact reciprocal) for validation.
# --------------------------------------------------------------------------
def bge_block_reference(hidden_states, attention_mask, params):
    x = hidden_states.reshape(-1, HIDDEN).astype(jnp.float32)
    S = x.shape[0]
    mask = attention_mask.reshape(1, S).astype(jnp.float32)
    qkv = x @ params["w_qkv"].astype(jnp.float32) + params["b_qkv"]
    q = qkv[:, :HIDDEN]
    k = qkv[:, HIDDEN:2 * HIDDEN]
    v = qkv[:, 2 * HIDDEN:]
    ctxs = []
    for h in range(NUM_HEADS):
        sl = slice(h * HEAD_DIM, (h + 1) * HEAD_DIM)
        sc = (q[:, sl] @ k[:, sl].T) * SCALE + mask
        p = jax.nn.softmax(sc, axis=-1)
        ctxs.append(p @ v[:, sl])
    ctx = jnp.concatenate(ctxs, axis=-1)
    attn_out = ctx @ params["w_o"].astype(jnp.float32) + params["b_o"]
    h1 = _layer_norm(attn_out + x, params["ln1_g"], params["ln1_b"])
    inter = jax.nn.gelu(h1 @ params["w_i"].astype(jnp.float32) + params["b_i"],
                        approximate=True)
    mlp = inter @ params["w_out"].astype(jnp.float32) + params["b_out"]
    out = _layer_norm(mlp + h1, params["ln2_g"], params["ln2_b"])
    return out.reshape(1, S, HIDDEN)


def init_params(key):
    ks = jax.random.split(key, 8)
    s = 0.02

    def w(k, shape):   # matmul weights stored in bf16 (halves weight DMA)
        return (jax.random.normal(k, shape) * s).astype(jnp.bfloat16)

    def b(k, shape):   # biases / LN params stay f32 (elementwise path)
        return (jax.random.normal(k, shape) * s).astype(jnp.float32)

    return dict(
        w_qkv=w(ks[0], (HIDDEN, 3 * HIDDEN)),
        b_qkv=b(ks[1], (1, 3 * HIDDEN)),
        w_o=w(ks[2], (HIDDEN, HIDDEN)),
        b_o=b(ks[3], (1, HIDDEN)),
        ln1_g=jnp.ones((1, HIDDEN), jnp.float32),
        ln1_b=jnp.zeros((1, HIDDEN), jnp.float32),
        w_i=w(ks[4], (HIDDEN, FFN)),
        b_i=b(ks[5], (1, FFN)),
        w_out=w(ks[6], (FFN, HIDDEN)),
        b_out=b(ks[7], (1, HIDDEN)),
        ln2_g=jnp.ones((1, HIDDEN), jnp.float32),
        ln2_b=jnp.zeros((1, HIDDEN), jnp.float32),
    )


if __name__ == "__main__":
    key = jax.random.PRNGKey(0)
    k_x, k_p = jax.random.split(key, 2)

    S = 32                                            # sequence length (2 tiles)
    hidden_states = jax.random.normal(k_x, (1, S, HIDDEN), jnp.float32)

    # BERT-style extended additive mask (1, 1, 1, S): last 8 tokens are padding.
    valid = jnp.arange(S) < (S - 8)
    attention_mask = jnp.where(valid, 0.0, -1e9).astype(jnp.float32)
    attention_mask = attention_mask.reshape(1, 1, 1, S)

    params = init_params(k_p)

    out = bge_block_forward(hidden_states, attention_mask, params)
    out = jax.block_until_ready(out)
    assert out.shape == (1, S, HIDDEN)

    ref = bge_block_reference(hidden_states, attention_mask, params)
    err = float(jnp.max(jnp.abs(out - ref)))
    assert jnp.all(jnp.isfinite(out)), "non-finite output"
    assert err < 0.1, f"kernel/reference mismatch: max abs err = {err}"

    print("KERNEL_OK")
</pallas_src>

<mosaic_0001>
module attributes {stable_mosaic.version = 11 : i64} {
  func.func @qkv_kernel(%arg0: i32, %arg1: memref<16x128xf32, #tpu.memory_space<vmem>>, %arg2: memref<128x384xbf16, #tpu.memory_space<vmem>>, %arg3: memref<1x384xf32, #tpu.memory_space<vmem>>, %arg4: memref<16x128xbf16, #tpu.memory_space<vmem>>, %arg5: memref<16x128xbf16, #tpu.memory_space<vmem>>, %arg6: memref<16x128xbf16, #tpu.memory_space<vmem>>) attributes {dimension_semantics = [#tpu.dimension_semantics<parallel>], iteration_bounds = array<i64: 2>, scalar_prefetch = 0 : i64, scratch_operands = 0 : i64, tpu.core_type = #tpu.core_type<tc>, window_params = [{transform_indices = @transform_0, window_bounds = array<i64: 16, 128>}, {pipeline_mode = #tpu.pipeline_mode<synchronous>, transform_indices = @transform_1, window_bounds = array<i64: 128, 384>}, {pipeline_mode = #tpu.pipeline_mode<synchronous>, transform_indices = @transform_2, window_bounds = array<i64: 1, 384>}, {transform_indices = @transform_3, window_bounds = array<i64: 16, 128>}, {transform_indices = @transform_4, window_bounds = array<i64: 16, 128>}, {transform_indices = @transform_5, window_bounds = array<i64: 16, 128>}]} {
    %c0 = arith.constant 0 : index
    %c0_0 = arith.constant 0 : index
    %0 = vector.load %arg1[%c0, %c0_0] : memref<16x128xf32, #tpu.memory_space<vmem>>, vector<16x128xf32>
    %1 = arith.truncf %0 : vector<16x128xf32> to vector<16x128xbf16>
    %c0_1 = arith.constant 0 : index
    %c0_2 = arith.constant 0 : index
    %2 = vector.load %arg2[%c0_1, %c0_2] : memref<128x384xbf16, #tpu.memory_space<vmem>>, vector<128x384xbf16>
    %cst = arith.constant dense<0.000000e+00> : vector<16x384xf32>
    %3 = tpu.matmul %1, %2, %cst {dimension_numbers = #tpu.dot_dimension_numbers<[1], [0], [0], [1], [0, 0, 1, 1], [], []>} : vector<16x128xbf16>, vector<128x384xbf16>, vector<16x384xf32> -> vector<16x384xf32>
    %c0_3 = arith.constant 0 : index
    %c0_4 = arith.constant 0 : index
    %4 = vector.load %arg3[%c0_3, %c0_4] : memref<1x384xf32, #tpu.memory_space<vmem>>, vector<1x384xf32>
    %5 = vector.broadcast %4 : vector<1x384xf32> to vector<16x384xf32>
    %6 = arith.addf %3, %5 : vector<16x384xf32>
    %7 = vector.extract_strided_slice %6 {offsets = [0, 0], sizes = [16, 128], strides = [1, 1]} : vector<16x384xf32> to vector<16x128xf32>
    %cst_5 = arith.constant 1.250000e-01 : f32
    %8 = vector.broadcast %cst_5 : f32 to vector<16x128xf32>
    %9 = arith.mulf %7, %8 : vector<16x128xf32>
    %10 = vector.extract_strided_slice %6 {offsets = [0, 128], sizes = [16, 128], strides = [1, 1]} : vector<16x384xf32> to vector<16x128xf32>
    %11 = vector.extract_strided_slice %6 {offsets = [0, 256], sizes = [16, 128], strides = [1, 1]} : vector<16x384xf32> to vector<16x128xf32>
    %12 = arith.truncf %9 : vector<16x128xf32> to vector<16x128xbf16>
    %c0_6 = arith.constant 0 : index
    %c0_7 = arith.constant 0 : index
    %13 = vector.load %arg4[%c0_6, %c0_7] : memref<16x128xbf16, #tpu.memory_space<vmem>>, vector<16x128xbf16>
    tpu.vector_store %arg4[%c0_6, %c0_7], %12 {strides = array<i32>} : memref<16x128xbf16, #tpu.memory_space<vmem>>, vector<16x128xbf16>,
    %14 = arith.truncf %10 : vector<16x128xf32> to vector<16x128xbf16>
    %c0_8 = arith.constant 0 : index
    %c0_9 = arith.constant 0 : index
    %15 = vector.load %arg5[%c0_8, %c0_9] : memref<16x128xbf16, #tpu.memory_space<vmem>>, vector<16x128xbf16>
    tpu.vector_store %arg5[%c0_8, %c0_9], %14 {strides = array<i32>} : memref<16x128xbf16, #tpu.memory_space<vmem>>, vector<16x128xbf16>,
    %16 = arith.truncf %11 : vector<16x128xf32> to vector<16x128xbf16>
    %c0_10 = arith.constant 0 : index
    %c0_11 = arith.constant 0 : index
    %17 = vector.load %arg6[%c0_10, %c0_11] : memref<16x128xbf16, #tpu.memory_space<vmem>>, vector<16x128xbf16>
    tpu.vector_store %arg6[%c0_10, %c0_11], %16 {strides = array<i32>} : memref<16x128xbf16, #tpu.memory_space<vmem>>, vector<16x128xbf16>,
    return
  }
  func.func @transform_0(%arg0: i32) -> (i32, i32) {
    %c0_i32 = arith.constant 0 : i32
    %c0_i32_0 = arith.constant 0 : i32
    return %arg0, %c0_i32 : i32, i32
  }
  func.func @transform_1(%arg0: i32) -> (i32, i32) {
    %c0_i32 = arith.constant 0 : i32
    %c0_i32_0 = arith.constant 0 : i32
    %c0_i32_1 = arith.constant 0 : i32
    return %c0_i32, %c0_i32_0 : i32, i32
  }
  func.func @transform_2(%arg0: i32) -> (i32, i32) {
    %c0_i32 = arith.constant 0 : i32
    %c0_i32_0 = arith.constant 0 : i32
    %c0_i32_1 = arith.constant 0 : i32
    return %c0_i32, %c0_i32_0 : i32, i32
  }
  func.func @transform_3(%arg0: i32) -> (i32, i32) {
    %c0_i32 = arith.constant 0 : i32
    %c0_i32_0 = arith.constant 0 : i32
    return %arg0, %c0_i32 : i32, i32
  }
  func.func @transform_4(%arg0: i32) -> (i32, i32) {
    %c0_i32 = arith.constant 0 : i32
    %c0_i32_0 = arith.constant 0 : i32
    return %arg0, %c0_i32 : i32, i32
  }
  func.func @transform_5(%arg0: i32) -> (i32, i32) {
    %c0_i32 = arith.constant 0 : i32
    %c0_i32_0 = arith.constant 0 : i32
    return %arg0, %c0_i32 : i32, i32
  }
}

module attributes {stable_mosaic.version = 11 : i64} {
  func.func @attn_ffn_kernel(%arg0: i32, %arg1: memref<16x128xf32, #tpu.memory_space<vmem>>, %arg2: memref<16x128xbf16, #tpu.memory_space<vmem>>, %arg3: memref<32x128xbf16, #tpu.memory_space<vmem>>, %arg4: memref<32x128xbf16, #tpu.memory_space<vmem>>, %arg5: memref<1x32xf32, #tpu.memory_space<vmem>>, %arg6: memref<128x128xbf16, #tpu.memory_space<vmem>>, %arg7: memref<1x128xf32, #tpu.memory_space<vmem>>, %arg8: memref<1x128xf32, #tpu.memory_space<vmem>>, %arg9: memref<1x128xf32, #tpu.memory_space<vmem>>, %arg10: memref<128x512xbf16, #tpu.memory_space<vmem>>, %arg11: memref<1x512xf32, #tpu.memory_space<vmem>>, %arg12: memref<512x128xbf16, #tpu.memory_space<vmem>>, %arg13: memref<1x128xf32, #tpu.memory_space<vmem>>, %arg14: memref<1x128xf32, #tpu.memory_space<vmem>>, %arg15: memref<1x128xf32, #tpu.memory_space<vmem>>, %arg16: memref<16x128xf32, #tpu.memory_space<vmem>>) attributes {dimension_semantics = [#tpu.dimension_semantics<parallel>], iteration_bounds = array<i64: 2>, scalar_prefetch = 0 : i64, scratch_operands = 0 : i64, tpu.core_type = #tpu.core_type<tc>, window_params = [{transform_indices = @transform_0, window_bounds = array<i64: 16, 128>}, {transform_indices = @transform_1, window_bounds = array<i64: 16, 128>}, {pipeline_mode = #tpu.pipeline_mode<synchronous>, transform_indices = @transform_2, window_bounds = array<i64: 32, 128>}, {pipeline_mode = #tpu.pipeline_mode<synchronous>, transform_indices = @transform_3, window_bounds = array<i64: 32, 128>}, {pipeline_mode = #tpu.pipeline_mode<synchronous>, transform_indices = @transform_4, window_bounds = array<i64: 1, 32>}, {pipeline_mode = #tpu.pipeline_mode<synchronous>, transform_indices = @transform_5, window_bounds = array<i64: 128, 128>}, {pipeline_mode = #tpu.pipeline_mode<synchronous>, transform_indices = @transform_6, window_bounds = array<i64: 1, 128>}, {pipeline_mode = #tpu.pipeline_mode<synchronous>, transform_indices = @transform_7, window_bounds = array<i64: 1, 128>}, {pipeline_mode = #tpu.pipeline_mode<synchronous>, transform_indices = @transform_8, window_bounds = array<i64: 1, 128>}, {pipeline_mode = #tpu.pipeline_mode<synchronous>, transform_indices = @transform_9, window_bounds = array<i64: 128, 512>}, {pipeline_mode = #tpu.pipeline_mode<synchronous>, transform_indices = @transform_10, window_bounds = array<i64: 1, 512>}, {pipeline_mode = #tpu.pipeline_mode<synchronous>, transform_indices = @transform_11, window_bounds = array<i64: 512, 128>}, {pipeline_mode = #tpu.pipeline_mode<synchronous>, transform_indices = @transform_12, window_bounds = array<i64: 1, 128>}, {pipeline_mode = #tpu.pipeline_mode<synchronous>, transform_indices = @transform_13, window_bounds = array<i64: 1, 128>}, {pipeline_mode = #tpu.pipeline_mode<synchronous>, transform_indices = @transform_14, window_bounds = array<i64: 1, 128>}, {transform_indices = @transform_15, window_bounds = array<i64: 16, 128>}]} {
    %c0 = arith.constant 0 : index
    %c0_0 = arith.constant 0 : index
    %0 = vector.load %arg1[%c0, %c0_0] : memref<16x128xf32, #tpu.memory_space<vmem>>, vector<16x128xf32>
    %c0_1 = arith.constant 0 : index
    %c0_2 = arith.constant 0 : index
    %1 = vector.load %arg2[%c0_1, %c0_2] : memref<16x128xbf16, #tpu.memory_space<vmem>>, vector<16x128xbf16>
    %c0_3 = arith.constant 0 : index
    %c0_4 = arith.constant 0 : index
    %2 = vector.load %arg3[%c0_3, %c0_4] : memref<32x128xbf16, #tpu.memory_space<vmem>>, vector<32x128xbf16>
    %c0_5 = arith.constant 0 : index
    %c0_6 = arith.constant 0 : index
    %3 = vector.load %arg4[%c0_5, %c0_6] : memref<32x128xbf16, #tpu.memory_space<vmem>>, vector<32x128xbf16>
    %c0_7 = arith.constant 0 : index
    %c0_8 = arith.constant 0 : index
    %4 = vector.load %arg5[%c0_7, %c0_8] : memref<1x32xf32, #tpu.memory_space<vmem>>, vector<1x32xf32>
    %5 = vector.extract_strided_slice %1 {offsets = [0, 0], sizes = [16, 64], strides = [1, 1]} : vector<16x128xbf16> to vector<16x64xbf16>
    %6 = vector.extract_strided_slice %2 {offsets = [0, 0], sizes = [32, 64], strides = [1, 1]} : vector<32x128xbf16> to vector<32x64xbf16>
    %7 = vector.extract_strided_slice %3 {offsets = [0, 0], sizes = [32, 64], strides = [1, 1]} : vector<32x128xbf16> to vector<32x64xbf16>
    %cst = arith.constant dense<0.000000e+00> : vector<16x32xf32>
    %8 = tpu.matmul %5, %6, %cst {dimension_numbers = #tpu.dot_dimension_numbers<[1], [1], [0], [0], [0, 0, 1, 0], [], []>} : vector<16x64xbf16>, vector<32x64xbf16>, vector<16x32xf32> -> vector<16x32xf32>
    %9 = vector.broadcast %4 : vector<1x32xf32> to vector<16x32xf32>
    %10 = arith.addf %8, %9 : vector<16x32xf32>
    %cst_9 = arith.constant dense<0xFF800000> : vector<16xf32>
    %11 = vector.multi_reduction <maximumf>, %10, %cst_9 [1] : vector<16x32xf32> to vector<16xf32>
    %12 = vector.shape_cast %11 : vector<16xf32> to vector<16x1xf32>
    %13 = vector.broadcast %12 : vector<16x1xf32> to vector<16x32xf32>
    %14 = arith.subf %10, %13 : vector<16x32xf32>
    %15 = math.exp %14 : vector<16x32xf32>
    %cst_10 = arith.constant dense<0.000000e+00> : vector<16xf32>
    %16 = vector.multi_reduction <add>, %15, %cst_10 [1] : vector<16x32xf32> to vector<16xf32>
    %17 = vector.shape_cast %16 : vector<16xf32> to vector<16x1xf32>
    %18 = tpu.reciprocal %17 {approx = true} : vector<16x1xf32> -> vector<16x1xf32>
    %19 = vector.broadcast %18 : vector<16x1xf32> to vector<16x32xf32>
    %20 = arith.mulf %15, %19 : vector<16x32xf32>
    %21 = arith.truncf %20 : vector<16x32xf32> to vector<16x32xbf16>
    %cst_11 = arith.constant dense<0.000000e+00> : vector<16x64xf32>
    %22 = tpu.matmul %21, %7, %cst_11 {dimension_numbers = #tpu.dot_dimension_numbers<[1], [0], [0], [1], [0, 0, 1, 1], [], []>} : vector<16x32xbf16>, vector<32x64xbf16>, vector<16x64xf32> -> vector<16x64xf32>
    %23 = vector.extract_strided_slice %1 {offsets = [0, 64], sizes = [16, 64], strides = [1, 1]} : vector<16x128xbf16> to vector<16x64xbf16>
    %24 = vector.extract_strided_slice %2 {offsets = [0, 64], sizes = [32, 64], strides = [1, 1]} : vector<32x128xbf16> to vector<32x64xbf16>
    %25 = vector.extract_strided_slice %3 {offsets = [0, 64], sizes = [32, 64], strides = [1, 1]} : vector<32x128xbf16> to vector<32x64xbf16>
    %cst_12 = arith.constant dense<0.000000e+00> : vector<16x32xf32>
    %26 = tpu.matmul %23, %24, %cst_12 {dimension_numbers = #tpu.dot_dimension_numbers<[1], [1], [0], [0], [0, 0, 1, 0], [], []>} : vector<16x64xbf16>, vector<32x64xbf16>, vector<16x32xf32> -> vector<16x32xf32>
    %27 = vector.broadcast %4 : vector<1x32xf32> to vector<16x32xf32>
    %28 = arith.addf %26, %27 : vector<16x32xf32>
    %cst_13 = arith.constant dense<0xFF800000> : vector<16xf32>
    %29 = vector.multi_reduction <maximumf>, %28, %cst_13 [1] : vector<16x32xf32> to vector<16xf32>
    %30 = vector.shape_cast %29 : vector<16xf32> to vector<16x1xf32>
    %31 = vector.broadcast %30 : vector<16x1xf32> to vector<16x32xf32>
    %32 = arith.subf %28, %31 : vector<16x32xf32>
    %33 = math.exp %32 : vector<16x32xf32>
    %cst_14 = arith.constant dense<0.000000e+00> : vector<16xf32>
    %34 = vector.multi_reduction <add>, %33, %cst_14 [1] : vector<16x32xf32> to vector<16xf32>
    %35 = vector.shape_cast %34 : vector<16xf32> to vector<16x1xf32>
    %36 = tpu.reciprocal %35 {approx = true} : vector<16x1xf32> -> vector<16x1xf32>
    %37 = vector.broadcast %36 : vector<16x1xf32> to vector<16x32xf32>
    %38 = arith.mulf %33, %37 : vector<16x32xf32>
    %39 = arith.truncf %38 : vector<16x32xf32> to vector<16x32xbf16>
    %cst_15 = arith.constant dense<0.000000e+00> : vector<16x64xf32>
    %40 = tpu.matmul %39, %25, %cst_15 {dimension_numbers = #tpu.dot_dimension_numbers<[1], [0], [0], [1], [0, 0, 1, 1], [], []>} : vector<16x32xbf16>, vector<32x64xbf16>, vector<16x64xf32> -> vector<16x64xf32>
    %41 = tpu.concatenate %22, %40 in 1 : vector<16x64xf32>, vector<16x64xf32> -> vector<16x128xf32>
    %42 = arith.truncf %41 : vector<16x128xf32> to vector<16x128xbf16>
    %c0_16 = arith.constant 0 : index
    %c0_17 = arith.constant 0 : index
    %43 = vector.load %arg6[%c0_16, %c0_17] : memref<128x128xbf16, #tpu.memory_space<vmem>>, vector<128x128xbf16>
    %cst_18 = arith.constant dense<0.000000e+00> : vector<16x128xf32>
    %44 = tpu.matmul %42, %43, %cst_18 {dimension_numbers = #tpu.dot_dimension_numbers<[1], [0], [0], [1], [0, 0, 1, 1], [], []>} : vector<16x128xbf16>, vector<128x128xbf16>, vector<16x128xf32> -> vector<16x128xf32>
    %c0_19 = arith.constant 0 : index
    %c0_20 = arith.constant 0 : index
    %45 = vector.load %arg7[%c0_19, %c0_20] : memref<1x128xf32, #tpu.memory_space<vmem>>, vector<1x128xf32>
    %46 = vector.broadcast %45 : vector<1x128xf32> to vector<16x128xf32>
    %47 = arith.addf %44, %46 : vector<16x128xf32>
    %48 = arith.addf %47, %0 : vector<16x128xf32>
    %c0_21 = arith.constant 0 : index
    %c0_22 = arith.constant 0 : index
    %49 = vector.load %arg8[%c0_21, %c0_22] : memref<1x128xf32, #tpu.memory_space<vmem>>, vector<1x128xf32>
    %c0_23 = arith.constant 0 : index
    %c0_24 = arith.constant 0 : index
    %50 = vector.load %arg9[%c0_23, %c0_24] : memref<1x128xf32, #tpu.memory_space<vmem>>, vector<1x128xf32>
    %cst_25 = arith.constant dense<0.000000e+00> : vector<16xf32>
    %51 = vector.multi_reduction <add>, %48, %cst_25 [1] : vector<16x128xf32> to vector<16xf32>
    %52 = vector.shape_cast %51 : vector<16xf32> to vector<16x1xf32>
    %cst_26 = arith.constant 1.280000e+02 : f32
    %53 = vector.broadcast %cst_26 : f32 to vector<16x1xf32>
    %54 = arith.divf %52, %53 : vector<16x1xf32>
    %55 = vector.broadcast %54 : vector<16x1xf32> to vector<16x128xf32>
    %56 = arith.subf %48, %55 : vector<16x128xf32>
    %57 = arith.mulf %56, %56 : vector<16x128xf32>
    %cst_27 = arith.constant dense<0.000000e+00> : vector<16xf32>
    %58 = vector.multi_reduction <add>, %57, %cst_27 [1] : vector<16x128xf32> to vector<16xf32>
    %59 = vector.shape_cast %58 : vector<16xf32> to vector<16x1xf32>
    %cst_28 = arith.constant 1.280000e+02 : f32
    %60 = vector.broadcast %cst_28 : f32 to vector<16x1xf32>
    %61 = arith.divf %59, %60 : vector<16x1xf32>
    %cst_29 = arith.constant 9.99999996E-13 : f32
    %62 = vector.broadcast %cst_29 : f32 to vector<16x1xf32>
    %63 = arith.addf %61, %62 : vector<16x1xf32>
    %64 = math.rsqrt %63 : vector<16x1xf32>
    %65 = vector.broadcast %64 : vector<16x1xf32> to vector<16x128xf32>
    %66 = arith.mulf %56, %65 : vector<16x128xf32>
    %67 = vector.broadcast %49 : vector<1x128xf32> to vector<16x128xf32>
    %68 = arith.mulf %66, %67 : vector<16x128xf32>
    %69 = vector.broadcast %50 : vector<1x128xf32> to vector<16x128xf32>
    %70 = arith.addf %68, %69 : vector<16x128xf32>
    %71 = arith.truncf %70 : vector<16x128xf32> to vector<16x128xbf16>
    %c0_30 = arith.constant 0 : index
    %c0_31 = arith.constant 0 : index
    %72 = vector.load %arg10[%c0_30, %c0_31] : memref<128x512xbf16, #tpu.memory_space<vmem>>, vector<128x512xbf16>
    %cst_32 = arith.constant dense<0.000000e+00> : vector<16x512xf32>
    %73 = tpu.matmul %71, %72, %cst_32 {dimension_numbers = #tpu.dot_dimension_numbers<[1], [0], [0], [1], [0, 0, 1, 1], [], []>} : vector<16x128xbf16>, vector<128x512xbf16>, vector<16x512xf32> -> vector<16x512xf32>
    %c0_33 = arith.constant 0 : index
    %c0_34 = arith.constant 0 : index
    %74 = vector.load %arg11[%c0_33, %c0_34] : memref<1x512xf32, #tpu.memory_space<vmem>>, vector<1x512xf32>
    %75 = vector.broadcast %74 : vector<1x512xf32> to vector<16x512xf32>
    %76 = arith.addf %73, %75 : vector<16x512xf32>
    %77 = arith.mulf %76, %76 : vector<16x512xf32>
    %78 = arith.mulf %76, %77 : vector<16x512xf32>
    %cst_35 = arith.constant 4.471500e-02 : f32
    %79 = vector.broadcast %cst_35 : f32 to vector<16x512xf32>
    %80 = arith.mulf %79, %78 : vector<16x512xf32>
    %81 = arith.addf %76, %80 : vector<16x512xf32>
    %cst_36 = arith.constant 0.797884583 : f32
    %82 = vector.broadcast %cst_36 : f32 to vector<16x512xf32>
    %83 = arith.mulf %82, %81 : vector<16x512xf32>
    %84 = math.tanh %83 : vector<16x512xf32>
    %cst_37 = arith.constant 1.000000e+00 : f32
    %85 = vector.broadcast %cst_37 : f32 to vector<16x512xf32>
    %86 = arith.addf %85, %84 : vector<16x512xf32>
    %cst_38 = arith.constant 5.000000e-01 : f32
    %87 = vector.broadcast %cst_38 : f32 to vector<16x512xf32>
    %88 = arith.mulf %87, %86 : vector<16x512xf32>
    %89 = arith.mulf %76, %88 : vector<16x512xf32>
    %90 = arith.truncf %89 : vector<16x512xf32> to vector<16x512xbf16>
    %c0_39 = arith.constant 0 : index
    %c0_40 = arith.constant 0 : index
    %91 = vector.load %arg12[%c0_39, %c0_40] : memref<512x128xbf16, #tpu.memory_space<vmem>>, vector<512x128xbf16>
    %cst_41 = arith.constant dense<0.000000e+00> : vector<16x128xf32>
    %92 = tpu.matmul %90, %91, %cst_41 {dimension_numbers = #tpu.dot_dimension_numbers<[1], [0], [0], [1], [0, 0, 1, 1], [], []>} : vector<16x512xbf16>, vector<512x128xbf16>, vector<16x128xf32> -> vector<16x128xf32>
    %c0_42 = arith.constant 0 : index
    %c0_43 = arith.constant 0 : index
    %93 = vector.load %arg13[%c0_42, %c0_43] : memref<1x128xf32, #tpu.memory_space<vmem>>, vector<1x128xf32>
    %94 = vector.broadcast %93 : vector<1x128xf32> to vector<16x128xf32>
    %95 = arith.addf %92, %94 : vector<16x128xf32>
    %96 = arith.addf %95, %70 : vector<16x128xf32>
    %c0_44 = arith.constant 0 : index
    %c0_45 = arith.constant 0 : index
    %97 = vector.load %arg14[%c0_44, %c0_45] : memref<1x128xf32, #tpu.memory_space<vmem>>, vector<1x128xf32>
    %c0_46 = arith.constant 0 : index
    %c0_47 = arith.constant 0 : index
    %98 = vector.load %arg15[%c0_46, %c0_47] : memref<1x128xf32, #tpu.memory_space<vmem>>, vector<1x128xf32>
    %cst_48 = arith.constant dense<0.000000e+00> : vector<16xf32>
    %99 = vector.multi_reduction <add>, %96, %cst_48 [1] : vector<16x128xf32> to vector<16xf32>
    %100 = vector.shape_cast %99 : vector<16xf32> to vector<16x1xf32>
    %cst_49 = arith.constant 1.280000e+02 : f32
    %101 = vector.broadcast %cst_49 : f32 to vector<16x1xf32>
    %102 = arith.divf %100, %101 : vector<16x1xf32>
    %103 = vector.broadcast %102 : vector<16x1xf32> to vector<16x128xf32>
    %104 = arith.subf %96, %103 : vector<16x128xf32>
    %105 = arith.mulf %104, %104 : vector<16x128xf32>
    %cst_50 = arith.constant dense<0.000000e+00> : vector<16xf32>
    %106 = vector.multi_reduction <add>, %105, %cst_50 [1] : vector<16x128xf32> to vector<16xf32>
    %107 = vector.shape_cast %106 : vector<16xf32> to vector<16x1xf32>
    %cst_51 = arith.constant 1.280000e+02 : f32
    %108 = vector.broadcast %cst_51 : f32 to vector<16x1xf32>
    %109 = arith.divf %107, %108 : vector<16x1xf32>
    %cst_52 = arith.constant 9.99999996E-13 : f32
    %110 = vector.broadcast %cst_52 : f32 to vector<16x1xf32>
    %111 = arith.addf %109, %110 : vector<16x1xf32>
    %112 = math.rsqrt %111 : vector<16x1xf32>
    %113 = vector.broadcast %112 : vector<16x1xf32> to vector<16x128xf32>
    %114 = arith.mulf %104, %113 : vector<16x128xf32>
    %115 = vector.broadcast %97 : vector<1x128xf32> to vector<16x128xf32>
    %116 = arith.mulf %114, %115 : vector<16x128xf32>
    %117 = vector.broadcast %98 : vector<1x128xf32> to vector<16x128xf32>
    %118 = arith.addf %116, %117 : vector<16x128xf32>
    %c0_53 = arith.constant 0 : index
    %c0_54 = arith.constant 0 : index
    %119 = vector.load %arg16[%c0_53, %c0_54] : memref<16x128xf32, #tpu.memory_space<vmem>>, vector<16x128xf32>
    tpu.vector_store %arg16[%c0_53, %c0_54], %118 {strides = array<i32>} : memref<16x128xf32, #tpu.memory_space<vmem>>, vector<16x128xf32>,
    return
  }
  func.func @transform_0(%arg0: i32) -> (i32, i32) {
    %c0_i32 = arith.constant 0 : i32
    %c0_i32_0 = arith.constant 0 : i32
    return %arg0, %c0_i32 : i32, i32
  }
  func.func @transform_1(%arg0: i32) -> (i32, i32) {
    %c0_i32 = arith.constant 0 : i32
    %c0_i32_0 = arith.constant 0 : i32
    return %arg0, %c0_i32 : i32, i32
  }
  func.func @transform_2(%arg0: i32) -> (i32, i32) {
    %c0_i32 = arith.constant 0 : i32
    %c0_i32_0 = arith.constant 0 : i32
    %c0_i32_1 = arith.constant 0 : i32
    return %c0_i32, %c0_i32_0 : i32, i32
  }
  func.func @transform_3(%arg0: i32) -> (i32, i32) {
    %c0_i32 = arith.constant 0 : i32
    %c0_i32_0 = arith.constant 0 : i32
    %c0_i32_1 = arith.constant 0 : i32
    return %c0_i32, %c0_i32_0 : i32, i32
  }
  func.func @transform_4(%arg0: i32) -> (i32, i32) {
    %c0_i32 = arith.constant 0 : i32
    %c0_i32_0 = arith.constant 0 : i32
    %c0_i32_1 = arith.constant 0 : i32
    return %c0_i32, %c0_i32_0 : i32, i32
  }
  func.func @transform_5(%arg0: i32) -> (i32, i32) {
    %c0_i32 = arith.constant 0 : i32
    %c0_i32_0 = arith.constant 0 : i32
    %c0_i32_1 = arith.constant 0 : i32
    return %c0_i32, %c0_i32_0 : i32, i32
  }
  func.func @transform_6(%arg0: i32) -> (i32, i32) {
    %c0_i32 = arith.constant 0 : i32
    %c0_i32_0 = arith.constant 0 : i32
    %c0_i32_1 = arith.constant 0 : i32
    return %c0_i32, %c0_i32_0 : i32, i32
  }
  func.func @transform_7(%arg0: i32) -> (i32, i32) {
    %c0_i32 = arith.constant 0 : i32
    %c0_i32_0 = arith.constant 0 : i32
    %c0_i32_1 = arith.constant 0 : i32
    return %c0_i32, %c0_i32_0 : i32, i32
  }
  func.func @transform_8(%arg0: i32) -> (i32, i32) {
    %c0_i32 = arith.constant 0 : i32
    %c0_i32_0 = arith.constant 0 : i32
    %c0_i32_1 = arith.constant 0 : i32
    return %c0_i32, %c0_i32_0 : i32, i32
  }
  func.func @transform_9(%arg0: i32) -> (i32, i32) {
    %c0_i32 = arith.constant 0 : i32
    %c0_i32_0 = arith.constant 0 : i32
    %c0_i32_1 = arith.constant 0 : i32
    return %c0_i32, %c0_i32_0 : i32, i32
  }
  func.func @transform_10(%arg0: i32) -> (i32, i32) {
    %c0_i32 = arith.constant 0 : i32
    %c0_i32_0 = arith.constant 0 : i32
    %c0_i32_1 = arith.constant 0 : i32
    return %c0_i32, %c0_i32_0 : i32, i32
  }
  func.func @transform_11(%arg0: i32) -> (i32, i32) {
    %c0_i32 = arith.constant 0 : i32
    %c0_i32_0 = arith.constant 0 : i32
    %c0_i32_1 = arith.constant 0 : i32
    return %c0_i32, %c0_i32_0 : i32, i32
  }
  func.func @transform_12(%arg0: i32) -> (i32, i32) {
    %c0_i32 = arith.constant 0 : i32
    %c0_i32_0 = arith.constant 0 : i32
    %c0_i32_1 = arith.constant 0 : i32
    return %c0_i32, %c0_i32_0 : i32, i32
  }
  func.func @transform_13(%arg0: i32) -> (i32, i32) {
    %c0_i32 = arith.constant 0 : i32
    %c0_i32_0 = arith.constant 0 : i32
    %c0_i32_1 = arith.constant 0 : i32
    return %c0_i32, %c0_i32_0 : i32, i32
  }
  func.func @transform_14(%arg0: i32) -> (i32, i32) {
    %c0_i32 = arith.constant 0 : i32
    %c0_i32_0 = arith.constant 0 : i32
    %c0_i32_1 = arith.constant 0 : i32
    return %c0_i32, %c0_i32_0 : i32, i32
  }
  func.func @transform_15(%arg0: i32) -> (i32, i32) {
    %c0_i32 = arith.constant 0 : i32
    %c0_i32_0 = arith.constant 0 : i32
    return %arg0, %c0_i32 : i32, i32
  }
}

</mosaic_0001>

<bundles_post_ra>
// kernel: bge_block_forward.2
= control target key start
LH: loop header
LB: loop body
LE: loop exit
PB: predicated region body
PF: predicated region fallthrough
CT: control target
= control target key end

     0   :  { %11 = vsyncpa [#allocation3], 0  ;;  %s1266_s0 = inlined_call_operand.hbm [shape: f32[32,128], index: 0, kind: input, shape index: {}]   ;;  %s1267_s1 = inlined_call_operand.hbm [shape: bf16[128,384], index: 1, kind: input, shape index: {}]   ;;  %s1268_s2 = inlined_call_operand.hbm [shape: f32[1,384], index: 2, kind: input, shape index: {}]   ;;  %s1269_s3 = inlined_call_operand.vmem [shape: bf16[32,128], index: 3, kind: output, shape index: {0}]   ;;  %s1270_s4 = inlined_call_operand.vmem [shape: bf16[32,128], index: 4, kind: output, shape index: {1}]   ;;  %s1271_s5 = inlined_call_operand.vmem [shape: bf16[32,128], index: 5, kind: output, shape index: {2}]  }
   0x1   :  { %13 = vsyncpa [#allocation3 + $0x1], 0 }
   0x2   :  { %14 = vsyncpa [#allocation5], 0  ;;  %s1113_s18 = smov 0   ;;  %s1115_s19 = smov 0  }
   0x3   :  { %s1117_s20 = smov 0   ;;  %s1119_s21 = smov 0  }
   0x4 LB: > { %s752_s22 = sadd.s32 4294967295, %s1071_s21   ;;  %p40_p0 = scmp.ne.s32.totalorder %s1063_s19, %s1059_s18  ;;  %s1071_s21 = sphi %s1119_s21, %s1287_s21   ;;  %s1067_s20 = sphi %s1117_s20, %s1286_s20   ;;  %s1063_s19 = sphi %s1115_s19, %s1285_s19   ;;  %s1059_s18 = sphi %s1113_s18, %s1284_s18  }
   0x5   : > { %p1135_p1 = scmp.eq.s32.totalorder %s752_s22, 0  ;;  %p754_p2 = scmp.ge.s32.totalorder %s1071_s21, 1 }
   0x6   : > { %p171_p3 = scmp.lt.s32.totalorder %s1071_s21, 3  ;;  %s1073_s26 = smov [#allocation4]  }
   0x7   : > { %s1276_s23 = scalar_select %p1135_p1, 1, 0 }
   0x8   : > { %p1143_p4 = por %p1135_p1, %p40_p0  ;;  %p1147_p5 = pnand %p754_p2, %p171_p3 }
   0x9   : > { %s183_s27 = sshll.u32 %s1073_s26, 4  ;;  %s1074_s29 = smov [#allocation6]   ;;  %s184_s27 = int_to_ptr.vmem [resolvable:$true] %s183_s27 }
   0xa   : > { %s1277_s24 = scalar_select %p1143_p4, 1, 0 }
   0xb   : > { %s1278_s25 = scalar_select %p1147_p5, 1, 0 }
   0xc   : > { %p864_p6 = pneg %p1147_p5  ;;  %s197_s30 = sshll.u32 %s1074_s29, 4  ;;  %s198_s30 = int_to_ptr.vmem [resolvable:$true] %s197_s30 }
   0xd   : > { %s964_s6 = scalar_lea.vmem %s184_s27, 3072  ;;  %p972_p12 = scmp.lt.s32.totalorder %s184_s27, %s184_s27 }
   0xe   : > { %p1155_p7 = pnand %p864_p6, %p1135_p1  ;;  %p965_p9 = scmp.ne.s32.totalorder %s184_s27, %s964_s6 }
   0xf   : > { %p973_p13 = scmp.lt.s32.totalorder %s964_s6, %s964_s6 }
  0x10   : > { %p955_p8 = pneg %p1155_p7 }
  0x11   : > { %p974_p0 = por %p973_p13, %p972_p12 }
  0x12   : > { %p967_p10 = pnand %p965_p9, %p955_p8 }
  0x14   : > { %p968_p11 = pneg %p967_p10 }
  0x16   : > { %p975_p2 = pnand %p974_p0, %p968_p11 }
  0x18   : > { %978 = shalt.err (!%p975_p2)
}
  0x19   : > { %s1075_s7 = smov 192   ;;  %s1076_s8 = smov 12  }
  0x1a   : > { %867 = dma.hbm_to_vmem [thread:$0]  (!%p1155_p7), %s1267_s1, 3072, %s184_s27, [#allocation5], %s1075_s7, %s1075_s7, %s1076_s8  }
  0x1b   : > { %s990_s11 = scalar_lea.vmem %s198_s30, 48  ;;  %s997_s12 = scalar_lea.vmem %s198_s30, 64 }
  0x1c   : > { %p991_p3 = scmp.ne.s32.totalorder %s198_s30, %s990_s11  ;;  %p998_p10 = scmp.lt.s32.totalorder %s198_s30, %s198_s30 }
  0x1d   : > { %p999_p12 = scmp.lt.s32.totalorder %s997_s12, %s990_s11 }
  0x1e   : > { %p993_p6 = pnand %p991_p3, %p955_p8 }
  0x1f   : > { %p1000_p11 = por %p999_p12, %p998_p10 }
  0x20   : > { %p994_p9 = pneg %p993_p6 }
  0x22   : > { %p1001_p13 = pnand %p1000_p11, %p994_p9 }
  0x24   : > { %1004 = shalt.err (!%p1001_p13)
}
  0x25   : > { %870 = dma.hbm_to_vmem [thread:$0]  (!%p1155_p7), %s1268_s2, 48, %s198_s30, [#allocation5]  }
  0x26   : > { %s1178_s15 = sadd.s32 1, %s1071_s21   ;;  %s27_s16 = sadd.s32 1, %s1067_s20 }
  0x27   : > { %s24_s17 = ssub.s32 %s1071_s21, %s1178_s15  ;;  %p34_p8 = scmp.ne.s32.totalorder %s1067_s20, %s1063_s19 }
  0x28   : > { %p25_p0 = scmp.eq.s32.totalorder %s24_s17, 0  ;;  %p35_p2 = scmp.eq.s32.totalorder %s1071_s21, 0 }
  0x29   : > { %p877_p3 = scmp.lt.s32.totalorder %s1071_s21, 2  ;;  %s208_s18 = sand.u32 1, %s1067_s20  }
  0x2a   : > { %s1189_s26 = scalar_select %p25_p0, %s1067_s20, %s27_s16  }
  0x2b   : > { %p36_p6 = por %p35_p2, %p34_p8  ;;  %s758_s27 = sshll.u32 %s208_s18, 4 }
  0x2c   : > { %s803_s28 = sshll.u32 %s1071_s21, 8  ;;  %s212_s30 = scalar_lea.vmem [#allocation2], %s758_s27 }
  0x2d   : > { %s1195_s7 = scalar_lea.hbm %s1266_s0, %s803_s28  ;;  %s219_s8 = sshll.u32 %s212_s30, 4  ;;  %s1201_s8 = int_to_ptr.vmem [resolvable:$true] %s219_s8 }
  0x2e   : > { %p1197_p7 = pnand %p877_p3, %p36_p6  ;;  %s1203_s10 = scalar_lea.sflag [#allocation3], %s208_s18 }
  0x2f   : > { %s1005_s11 = scalar_lea.hbm %s1195_s7, 256  ;;  %s1010_s14 = scalar_lea.hbm %s1266_s0, 512 }
  0x30   : > { %p1006_p9 = scmp.ne.s32.totalorder %s1195_s7, %s1005_s11  ;;  %p1007_p10 = pneg %p1197_p7 }
  0x31   : > { %p1011_p13 = scmp.lt.s32.totalorder %s1195_s7, %s1266_s0  ;;  %p1012_p8 = scmp.lt.s32.totalorder %s1010_s14, %s1005_s11 }
  0x32   : > { %p1008_p12 = pnand %p1007_p10, %p1006_p9 }
  0x33   : > { %p1013_p0 = por %p1012_p8, %p1011_p13 }
  0x34   : > { %p1009_p11 = pneg %p1008_p12 }
  0x36   : > { %p1014_p2 = pnand %p1013_p0, %p1009_p11 }
  0x38   : > { %1017 = shalt.err (!%p1014_p2)
}
  0x39   : > { %s1018_s18 = scalar_lea.vmem %s1201_s8, 256  ;;  %s1077_s27 = smov [#allocation2]  }
  0x3a   : > { %p1019_p3 = scmp.ne.s32.totalorder %s1201_s8, %s1018_s18  ;;  %s1023_s28 = sshll.u32 %s1077_s27, 4  ;;  %s1024_s28 = int_to_ptr.vmem [resolvable:$false] %s1023_s28 }
  0x3b   : > { %s1025_s29 = scalar_lea.vmem %s1024_s28, 512  ;;  %p1026_p12 = scmp.lt.s32.totalorder %s1201_s8, %s1024_s28 }
  0x3c   : > { %p1021_p6 = pnand %p1019_p3, %p1007_p10  ;;  %p1027_p1 = scmp.lt.s32.totalorder %s1025_s29, %s1018_s18 }
  0x3e   : > { %p1022_p9 = pneg %p1021_p6  ;;  %p1028_p4 = por %p1027_p1, %p1026_p12 }
  0x40   : > { %p1029_p5 = pnand %p1028_p4, %p1022_p9 }
  0x42   : > { %1032 = shalt.err (!%p1029_p5)
}
  0x43   : > { %s1078_s6 = smov 128   ;;  %s1079_s30 = smov 8  }
  0x44   : > { %874 = dma.hbm_to_vmem [thread:$0]  (!%p1197_p7), %s1195_s7, 256, %s1201_s8, %s1203_s10, %s1078_s6, %s1078_s6, %s1079_s30  }
  0x45   : > { %p1281_p10 = scmp.ne.s32.totalorder %s1278_s25, 0 }
  0x46   : > { %s233_s11 = sand.u32 (!%p1281_p10), 1, %s1063_s19   ;;  %p1282_p1 = scmp.ne.s32.totalorder (!%p1281_p10), %s1277_s24, 0 }
  0x47   : > { %231 = sbr.rel (%p1281_p10) target bundleno = 318 (0x13e), region = 32  ;;  %s1227_s12 = sshll.u32 (!%p1281_p10), %s233_s11, 4 }
  0x48   : > { %s234_s13 = scalar_lea.sflag (!%p1281_p10), [#allocation3], %s233_s11  ;;  %s237_s14 = scalar_lea.vmem (!%p1281_p10), [#allocation2], %s1227_s12 }
  0x4c   : > { %1050 = dma.done.wait (%p1282_p1), %s234_s13, 256  }
  0x4d   : > { %1052 = vsyncadd (%p1282_p1), %s234_s13, 4294967040  ;;  %p1283_p4 = scmp.ne.s32.totalorder %s1276_s23, 0 }
  0x4f   : > { %1054 = dma.done.wait (%p1283_p4), [#allocation5], 3120  }
  0x50   : > { %1056 = vsyncadd (%p1283_p4), [#allocation5], 4294964176  ;;  %v1080_v0 = vmov 0.0   ;;  %vm1081_vm0 = vmmov 0   ;;  %v1082_v1 = vmov 0   ;;  %v302_v25 = vld [vmem:[%s237_s14] sm:$0xff]  ;;  %v339_v29 = vlaneseq }
  0x51   : > { %834 = vmatprep.subr.bf16.mxu1 %v1080_v0  ;;  %850 = vmatprep.mubr.msk.bf16.mxu1 %vm1081_vm0, %v1080_v0  ;;  %v921_v2 = vld [vmem:[#allocation4 + $0xac] ss:$12 sps:$4 sm:$0xff]   ;;  %v923_v3 = vld [vmem:[#allocation4 + $0xb0] ss:$12 sps:$4 sm:$0xff]   ;;  %v924_v4 = vld [vmem:[#allocation4 + $0xa8] ss:$12 sps:$4 sm:$0xff]  }
  0x52   : > { %514 = vmatprep.mubr.bf16.mxu0 %v1082_v1  ;;  %482 = vmatprep.subr.bf16.mxu0 %v921_v2  ;;  %v925_v5 = vld [vmem:[#allocation4 + $0x94] ss:$12 sps:$4 sm:$0xff]   ;;  %v927_v6 = vld [vmem:[#allocation4 + $0x98] ss:$12 sps:$4 sm:$0xff]   ;;  %v928_v7 = vld [vmem:[#allocation4 + $0x90] ss:$12 sps:$4 sm:$0xff]  }
  0x53   : > { %835 = vmatpush3.bf16.msra.mxu1 %v923_v3  ;;  %483 = vmatpush1.bf16.msra.mxu0 %v924_v4  ;;  %v929_v8 = vld [vmem:[#allocation4 + $0x7c] ss:$12 sps:$4 sm:$0xff]   ;;  %v931_v9 = vld [vmem:[#allocation4 + $0x80] ss:$12 sps:$4 sm:$0xff]   ;;  %v932_v10 = vld [vmem:[#allocation4 + $0x78] ss:$12 sps:$4 sm:$0xff]  }
  0x54   : > { %836 = vmatprep.subr.bf16.mxu1 %v1080_v0  ;;  %484 = vmatprep.subr.bf16.mxu0 %v925_v5  ;;  %v933_v11 = vld [vmem:[#allocation4 + $0x64] ss:$12 sps:$4 sm:$0xff]   ;;  %v935_v12 = vld [vmem:[#allocation4 + $0x68] ss:$12 sps:$4 sm:$0xff]   ;;  %v936_v13 = vld [vmem:[#allocation4 + $0x60] ss:$12 sps:$4 sm:$0xff]  }
  0x55   : > { %v937_v14 = vld [vmem:[#allocation4 + $0x4c] ss:$12 sps:$4 sm:$0xff]   ;;  %v939_v15 = vld [vmem:[#allocation4 + $0x50] ss:$12 sps:$4 sm:$0xff]   ;;  %v940_v16 = vld [vmem:[#allocation4 + $0x48] ss:$12 sps:$4 sm:$0xff]  }
  0x56   : > { %v941_v17 = vld [vmem:[#allocation4 + $0x34] ss:$12 sps:$4 sm:$0xff]   ;;  %v943_v18 = vld [vmem:[#allocation4 + $0x38] ss:$12 sps:$4 sm:$0xff]   ;;  %v944_v19 = vld [vmem:[#allocation4 + $0x30] ss:$12 sps:$4 sm:$0xff]  }
  0x57   : > { %837 = vmatpush3.bf16.msra.mxu1 %v927_v6  ;;  %485 = vmatpush1.bf16.msra.mxu0 %v928_v7  ;;  %v945_v20 = vld [vmem:[#allocation4 + $0x1c] ss:$12 sps:$4 sm:$0xff]   ;;  %v947_v21 = vld [vmem:[#allocation4 + $0x20] ss:$12 sps:$4 sm:$0xff]   ;;  %v948_v22 = vld [vmem:[#allocation4 + $0x18] ss:$12 sps:$4 sm:$0xff]  }
  0x58   : > { %838 = vmatprep.subr.bf16.mxu1 %v1080_v0  ;;  %486 = vmatprep.subr.bf16.mxu0 %v929_v8  ;;  %v949_v23 = vld [vmem:[#allocation4 + $0x4] ss:$12 sps:$4 sm:$0xff]   ;;  %v951_v24 = vld [vmem:[#allocation4 + $0x8] ss:$12 sps:$4 sm:$0xff]   ;;  %v952_v27 = vld [vmem:[#allocation4] ss:$12 sps:$4 sm:$0xff]  }
  0x59   : > { %v303_v26 = vld [vmem:[%s237_s14 + $0x8] sm:$0xff]  ;;  %v340_v30 = vshrl.u32 %v339_v29, 7  ;;  %s765_s23 = sshll.u32 %s752_s22, 1  ;;  %v337_v33 = vld [vmem:[#allocation6] sm:$0x7] }
  0x5a   : > { %v304_v28 = vpack.c.bf16 %v303_v26, %v302_v25  ;;  %p284_p5 = scmp.lt.s32.totalorder %s765_s23, 3 }
  0x5b   : > { %839 = vmatpush3.bf16.msra.mxu1 %v931_v9  ;;  %487 = vmatpush1.bf16.msra.mxu0 %v932_v10  ;;  %v349_v31 = vsub.s32 2, %v340_v30  ;;  %v341_v32 = vsub.s32 0, %v340_v30  ;;  %v345_v37 = vsub.s32 1, %v340_v30 }
  0x5c   : > { %840 = vmatprep.subr.bf16.mxu1 %v1080_v0  ;;  %488 = vmatprep.subr.bf16.mxu0 %v933_v11  ;;  %s1289_s23 = smov (!%p284_p5, %s765_s23), 3 }
  0x5d   : > { %v350_v34 = vrot.slane %v337_v33, %v349_v31  ;;  %v342_v36 = vrot.slane %v337_v33, %v341_v32  ;;  %s766_s24 = sshll.u32 %s1289_s23, 2  ;;  %v346_v43 = vrot.slane %v337_v33, %v345_v37 }
  0x5e   : > { %s299_s25 = scalar_lea.vmem %s1271_s5, %s766_s24  ;;  %s287_s9 = scalar_lea.vmem %s1269_s3, %s766_s24 }
  0x5f   : > { %841 = vmatpush3.bf16.msra.mxu1 %v935_v12  ;;  %489 = vmatpush1.bf16.msra.mxu0 %v936_v13  ;;  %s293_s17 = scalar_lea.vmem %s1270_s4, %s766_s24 }
  0x60   : > { %842 = vmatprep.subr.bf16.mxu1 %v1080_v0  ;;  %490 = vmatprep.subr.bf16.mxu0 %v937_v14 }
  0x63   : > { %843 = vmatpush3.bf16.msra.mxu1 %v939_v15  ;;  %491 = vmatpush1.bf16.msra.mxu0 %v940_v16 }
  0x64   : > { %844 = vmatprep.subr.bf16.mxu1 %v1080_v0  ;;  %492 = vmatprep.subr.bf16.mxu0 %v941_v17 }
  0x67   : > { %845 = vmatpush3.bf16.msra.mxu1 %v943_v18  ;;  %493 = vmatpush1.bf16.msra.mxu0 %v944_v19 }
  0x68   : > { %846 = vmatprep.subr.bf16.mxu1 %v1080_v0  ;;  %494 = vmatprep.subr.bf16.mxu0 %v945_v20 }
  0x6b   : > { %847 = vmatpush3.bf16.msra.mxu1 %v947_v21  ;;  %495 = vmatpush1.bf16.msra.mxu0 %v948_v22 }
  0x6c   : > { %848 = vmatprep.subr.bf16.mxu1 %v1080_v0  ;;  %496 = vmatprep.subr.bf16.mxu0 %v949_v23 }
  0x6f   : > { %849 = vmatpush3.bf16.msra.mxu1 %v951_v24  ;;  %497 = vmatpush1.bf16.msra.mxu0 %v952_v27 }
  0x72   : > { %851 = vmatmul.mubr.bf16.vlgmr.msra.gmra.mxu1 %v304_v28  ;;  %515 = vmatmul.mubr.bf16.vlgmr.msra.gmra.mxu0 %v304_v28 }
 0x132   : > { %v559_v35 = vpop.f32.mrf.mxu1  ;;  %v516_v38 = vpop.f32.mrf.mxu0 }
 0x133   : > { %v560_v40 = vadd.f32 %v559_v35, %v350_v34  ;;  %v517_v42 = vadd.f32 %v516_v38, %v342_v36 }
 0x134   : > { %v852_v39 = vpop.f32.mrf.mxu1  ;;  %v518_v41 = vpop.f32.mrf.mxu0 }
 0x135   : > { %v566_v51 = vmul.f32 0.125, %v517_v42  ;;  %v519_v52 = vadd.f32 %v518_v41, %v346_v43 }
 0x136   : > { %v562_v44 = vpop.f32.mrf.mxu1  ;;  %v520_v46 = vpop.f32.mrf.mxu0 }
 0x137   : > { %v563_v45 = vadd.f32 %v562_v44, %v350_v34  ;;  %v521_v47 = vadd.f32 %v520_v46, %v342_v36 }
 0x138   : > { %v853_v48 = vpop.f32.mrf.mxu1  ;;  %v522_v50 = vpop.f32.mrf.mxu0 }
 0x139   : > { %v823_v49 = vpack.c.bf16 %v563_v45, %v560_v40  ;;  %v567_v53 = vmul.f32 0.125, %v521_v47  ;;  %v523_v54 = vadd.f32 %v522_v50, %v346_v43 }
 0x13b   : > { %824 = vst [vmem:[%s299_s25] sm:$0xff] %v823_v49   ;;  %v813_v55 = vpack.c.bf16 %v567_v53, %v566_v51  ;;  %v818_v56 = vpack.c.bf16 %v523_v54, %v519_v52 }
 0x13d   : > { %814 = vst [vmem:[%s287_s9] sm:$0xff] %v813_v55   ;;  %819 = vst [vmem:[%s293_s17] sm:$0xff] %v818_v56  }
 0x13e PF: > { %p17_p7 = scmp.ge.s32.totalorder %s1178_s15, 4   ;;  %s1284_s18 = smov %s1063_s19 }
 0x13f   : > { %s1285_s19 = smov %s1067_s20  ;;  %s1286_s20 = smov %s1189_s26 }
 0x140   : > { %s1287_s21 = smov %s1178_s15  ;;  %19 = sbr.rel (!%p17_p7) target bundleno = 4 (0x4), region = 104 }
 0x145   :  { %654 = vsyncpa [#allocation3], 1 }
 0x146   :  { %656 = vsyncpa [#allocation3 + $0x1], 1 }
 0x147   :  { %657 = vsyncpa [#allocation5], 1 }

// kernel: bge_block_forward.3
= control target key start
LH: loop header
LB: loop body
LE: loop exit
PB: predicated region body
PF: predicated region fallthrough
CT: control target
= control target key end

     0   :  { %s3496_s0 = inlined_call_operand.hbm [shape: f32[32,128], index: 0, kind: input, shape index: {}]   ;;  %s3497_s1 = inlined_call_operand.vmem [shape: bf16[32,128], index: 1, kind: input, shape index: {}]   ;;  %s3498_s2 = inlined_call_operand.vmem [shape: bf16[32,128], index: 2, kind: input, shape index: {}]   ;;  %s3499_s3 = inlined_call_operand.vmem [shape: bf16[32,128], index: 3, kind: input, shape index: {}]   ;;  %s3500_s4 = inlined_call_operand.vmem [shape: f32[1,32], index: 4, kind: input, shape index: {}]   ;;  %s3501_s5 = inlined_call_operand.hbm [shape: bf16[128,128], index: 5, kind: input, shape index: {}]   ;;  %s3502_s6 = inlined_call_operand.vmem [shape: f32[1,128], index: 6, kind: input, shape index: {}]   ;;  %s3503_s7 = inlined_call_operand.hbm [shape: f32[1,128], index: 7, kind: input, shape index: {}]   ;;  %s3504_s8 = inlined_call_operand.hbm [shape: f32[1,128], index: 8, kind: input, shape index: {}]   ;;  %s3505_s9 = inlined_call_operand.hbm [shape: bf16[128,512], index: 9, kind: input, shape index: {}]   ;;  %s3506_s10 = inlined_call_operand.hbm [shape: f32[1,512], index: 10, kind: input, shape index: {}]   ;;  %s3507_s11 = inlined_call_operand.vmem [shape: bf16[512,128], index: 11, kind: input, shape index: {}]   ;;  %s3508_s12 = inlined_call_operand.hbm [shape: f32[1,128], index: 12, kind: input, shape index: {}]   ;;  %s3509_s13 = inlined_call_operand.hbm [shape: f32[1,128], index: 13, kind: input, shape index: {}]   ;;  %s3510_s14 = inlined_call_operand.hbm [shape: f32[1,128], index: 14, kind: input, shape index: {}]   ;;  %s3511_s15 = inlined_call_operand.hbm [shape: f32[32,128], index: 15, kind: output, shape index: {}]  }
   0x1   :  { %3519 = sst [smem:[#allocation24_spill]] %s3499_s3 }
   0x2   :  { %3520 = sst [smem:[#allocation25_spill]] %s3501_s5 }
   0x3   :  { %3521 = sst [smem:[#allocation26_spill]] %s3502_s6 }
   0x4   :  { %3522 = sst [smem:[#allocation27_spill]] %s3503_s7 }
   0x5   :  { %3523 = sst [smem:[#allocation28_spill]] %s3504_s8 }
   0x6   :  { %3524 = sst [smem:[#allocation29_spill]] %s3505_s9 }
   0x7   :  { %3525 = sst [smem:[#allocation30_spill]] %s3506_s10 }
   0x8   :  { %3526 = sst [smem:[#allocation31_spill]] %s3507_s11 }
   0x9   :  { %3527 = sst [smem:[#allocation32_spill]] %s3511_s15 }
   0xa   :  { %20 = vsyncpa [#allocation3], 0 }
   0xb   :  { %22 = vsyncpa [#allocation3 + $0x1], 0 }
   0xc   :  { %23 = vsyncpa [#allocation6], 0 }
   0xd   :  { %24 = vsyncpa [#allocation9], 0 }
   0xe   :  { %25 = vsyncpa [#allocation12], 0 }
   0xf   :  { %26 = vsyncpa [#allocation15], 0 }
  0x10   :  { %27 = vsyncpa [#allocation4], 0 }
  0x11   :  { %29 = vsyncpa [#allocation4 + $0x1], 0  ;;  %s2979_s18 = smov 0   ;;  %s2981_s19 = smov 0  }
  0x12   :  { %s2983_s20 = smov 0   ;;  %s2985_s21 = smov 0  }
  0x13 LB: > { %s2877_s22 = smov [#allocation5]   ;;  %s3000_s24 = sadd.s32 4294967295, %s2875_s21   ;;  %s2875_s21 = sphi %s2985_s21, %s3562_s21   ;;  %s2871_s20 = sphi %s2983_s20, %s3561_s20   ;;  %s2867_s19 = sphi %s2981_s19, %s3560_s19   ;;  %s2863_s18 = sphi %s2979_s18, %s3559_s18  }
  0x14   : > { %s412_s23 = sshll.u32 %s2877_s22, 4  ;;  %p2044_p0 = scmp.ge.s32.totalorder %s2875_s21, 1  ;;  %s413_s23 = int_to_ptr.vmem [resolvable:$true] %s412_s23 }
  0x15   : > { %p3515_p1 = scmp.eq.s32.totalorder %s3000_s24, 0  ;;  %p391_p2 = scmp.lt.s32.totalorder %s2875_s21, 3 }
  0x16   : > { %s2878_s26 = smov [#allocation8]   ;;  %s2879_s29 = smov [#allocation11]  }
  0x17   : > { %p3005_p3 = pnand %p2044_p0, %p391_p2  ;;  %s440_s27 = sshll.u32 %s2878_s26, 4  ;;  %s441_s27 = int_to_ptr.vmem [resolvable:$true] %s440_s27 }
  0x18   : > { %s464_s30 = sshll.u32 %s2879_s29, 4  ;;  %s2570_s17 = scalar_lea.vmem %s413_s23, 1024  ;;  %s3018_s30 = int_to_ptr.vmem [resolvable:$true] %s464_s30 }
  0x19   : > { %s3528_s25 = scalar_select %p3005_p3, 1, 0 }
  0x1a   : > { %p2318_p5 = pneg %p3005_p3  ;;  %p2571_p8 = scmp.ne.s32.totalorder %s413_s23, %s2570_s17 }
  0x1b   : > { %p2578_p11 = scmp.lt.s32.totalorder %s413_s23, %s413_s23  ;;  %p2579_p12 = scmp.lt.s32.totalorder %s2570_s17, %s2570_s17 }
  0x1c   : > { %p3014_p6 = pnand %p2318_p5, %p3515_p1 }
  0x1d   : > { %p2580_p13 = por %p2579_p12, %p2578_p11 }
  0x1e   : > { %p3022_p7 = pneg %p3014_p6 }
  0x20   : > { %p2573_p9 = pnand %p2571_p8, %p3022_p7 }
  0x22   : > { %p2574_p10 = pneg %p2573_p9 }
  0x24   : > { %p2581_p0 = pnand %p2580_p13, %p2574_p10 }
  0x26   : > { %2584 = shalt.err (!%p2581_p0)
}
  0x27   : > { %s2880_s22 = smov 64   ;;  %s2881_s26 = smov 4  }
  0x28   : > { %s3531_s5 = sld [smem:[#allocation25_spill]]  ;;  %s2596_s11 = scalar_lea.vmem %s441_s27, 16 }
  0x29   : > { %p2597_p2 = scmp.ne.s32.totalorder %s441_s27, %s2596_s11  ;;  %s2603_s6 = scalar_lea.vmem %s441_s27, 32 }
  0x2a   : > { %p2604_p9 = scmp.lt.s32.totalorder %s441_s27, %s441_s27  ;;  %p2605_p4 = scmp.lt.s32.totalorder %s2603_s6, %s2596_s11 }
  0x2b   : > { %p2599_p5 = pnand %p2597_p2, %p3022_p7 }
  0x2c   : > { %p2606_p11 = por %p2605_p4, %p2604_p9 }
  0x2d   : > { %p2600_p8 = pneg %p2599_p5 }
  0x2e   : > { %2321 = dma.hbm_to_vmem [thread:$0]  (!%p3014_p6), %s3531_s5, 1024, %s413_s23, [#allocation6], %s2880_s22, %s2880_s22, %s2881_s26  }
  0x2f   : > { %p2607_p10 = pnand %p2606_p11, %p2600_p8 }
  0x31   : > { %2610 = shalt.err (!%p2607_p10)
}
  0x32   : > { %s3532_s8 = sld [smem:[#allocation28_spill]]  ;;  %s2622_s15 = scalar_lea.vmem %s3018_s30, 64 }
  0x33   : > { %p2623_p12 = scmp.ne.s32.totalorder %s3018_s30, %s2622_s15  ;;  %p2630_p2 = scmp.lt.s32.totalorder %s3018_s30, %s3018_s30 }
  0x34   : > { %p2631_p4 = scmp.lt.s32.totalorder %s2622_s15, %s2622_s15 }
  0x35   : > { %p2625_p13 = pnand %p2623_p12, %p3022_p7 }
  0x36   : > { %p2632_p5 = por %p2631_p4, %p2630_p2 }
  0x37   : > { %p2626_p0 = pneg %p2625_p13 }
  0x38   : > { %2327 = dma.hbm_to_vmem [thread:$0]  (!%p3014_p6), %s3532_s8, 16, %s441_s27, [#allocation9]  }
  0x39   : > { %p2633_p8 = pnand %p2632_p5, %p2626_p0 }
  0x3b   : > { %2636 = shalt.err (!%p2633_p8)
}
  0x3c   : > { %s3533_s10 = sld [smem:[#allocation30_spill]]  ;;  %s2882_s11 = smov [#allocation14]  }
  0x3d   : > { %s489_s23 = sshll.u32 %s2882_s11, 4  ;;  %s2883_s27 = smov [#allocation7]   ;;  %s490_s23 = int_to_ptr.vmem [resolvable:$true] %s489_s23 }
  0x3e   : > { %s429_s22 = sshll.u32 %s2883_s27, 4  ;;  %s2648_s26 = scalar_lea.vmem %s490_s23, 16  ;;  %s430_s22 = int_to_ptr.vmem [resolvable:$true] %s429_s22 }
  0x3f   : > { %p2649_p9 = scmp.ne.s32.totalorder %s490_s23, %s2648_s26  ;;  %s2655_s29 = scalar_lea.vmem %s490_s23, 32 }
  0x40   : > { %p2656_p12 = scmp.lt.s32.totalorder %s490_s23, %s490_s23  ;;  %p2657_p13 = scmp.lt.s32.totalorder %s2655_s29, %s2648_s26 }
  0x41   : > { %p2651_p11 = pnand %p2649_p9, %p3022_p7 }
  0x42   : > { %2333 = dma.hbm_to_vmem [thread:$0]  (!%p3014_p6), %s3533_s10, 64, %s3018_s30, [#allocation12]  }
  0x43   : > { %p2652_p10 = pneg %p2651_p11  ;;  %p2658_p0 = por %p2657_p13, %p2656_p12 }
  0x45   : > { %p2659_p2 = pnand %p2658_p0, %p2652_p10 }
  0x47   : > { %2662 = shalt.err (!%p2659_p2)
}
  0x48   : > { %2339 = dma.hbm_to_vmem [thread:$0]  (!%p3014_p6), %s3509_s13, 16, %s490_s23, [#allocation15]  }
  0x49   : > { %s2674_s15 = scalar_lea.vmem %s430_s22, 16  ;;  %s2681_s3 = scalar_lea.vmem %s430_s22, 32 }
  0x4a   : > { %p2675_p4 = scmp.ne.s32.totalorder %s430_s22, %s2674_s15  ;;  %p2682_p9 = scmp.lt.s32.totalorder %s430_s22, %s430_s22 }
  0x4b   : > { %p2683_p11 = scmp.lt.s32.totalorder %s2681_s3, %s2674_s15 }
  0x4c   : > { %p2677_p5 = pnand %p2675_p4, %p3022_p7 }
  0x4d   : > { %p2684_p1 = por %p2683_p11, %p2682_p9 }
  0x4e   : > { %p2678_p8 = pneg %p2677_p5 }
  0x50   : > { %p2685_p12 = pnand %p2684_p1, %p2678_p8 }
  0x52   : > { %2688 = shalt.err (!%p2685_p12)
}
  0x53   : > { %s3534_s7 = sld [smem:[#allocation27_spill]]  ;;  %s2884_s23 = smov [#allocation10]  }
  0x54   : > { %s450_s27 = sshll.u32 %s2884_s23, 4  ;;  %s451_s27 = int_to_ptr.vmem [resolvable:$true] %s450_s27 }
  0x55   : > { %s2700_s26 = scalar_lea.vmem %s451_s27, 4096  ;;  %p2708_p2 = scmp.lt.s32.totalorder %s451_s27, %s451_s27 }
  0x56   : > { %p2701_p10 = scmp.ne.s32.totalorder %s451_s27, %s2700_s26  ;;  %p2709_p4 = scmp.lt.s32.totalorder %s2700_s26, %s2700_s26 }
  0x58   : > { %p2703_p13 = pnand %p2701_p10, %p3022_p7  ;;  %p2710_p5 = por %p2709_p4, %p2708_p2 }
  0x59   : > { %2324 = dma.hbm_to_vmem [thread:$0]  (!%p3014_p6), %s3534_s7, 16, %s430_s22, [#allocation6]  }
  0x5a   : > { %p2704_p0 = pneg %p2703_p13 }
  0x5c   : > { %p2711_p1 = pnand %p2710_p5, %p2704_p0 }
  0x5e   : > { %2714 = shalt.err (!%p2711_p1)
}
  0x5f   : > { %s2885_s29 = smov 256   ;;  %s2886_s17 = smov 16  }
  0x60   : > { %s3535_s9 = sld [smem:[#allocation29_spill]]  ;;  %s2887_s15 = smov [#allocation13]  }
  0x61   : > { %s478_s3 = sshll.u32 %s2887_s15, 4  ;;  %s2888_s6 = smov [#allocation16]   ;;  %s479_s3 = int_to_ptr.vmem [resolvable:$true] %s478_s3 }
  0x62   : > { %s500_s11 = sshll.u32 %s2888_s6, 4  ;;  %s2726_s23 = scalar_lea.vmem %s479_s3, 16  ;;  %s501_s11 = int_to_ptr.vmem [resolvable:$true] %s500_s11 }
  0x63   : > { %p2727_p8 = scmp.ne.s32.totalorder %s479_s3, %s2726_s23  ;;  %s2733_s26 = scalar_lea.vmem %s479_s3, 32 }
  0x64   : > { %p2734_p12 = scmp.lt.s32.totalorder %s479_s3, %s479_s3  ;;  %p2735_p10 = scmp.lt.s32.totalorder %s2733_s26, %s2726_s23 }
  0x65   : > { %p2729_p9 = pnand %p2727_p8, %p3022_p7 }
  0x66   : > { %2330 = dma.hbm_to_vmem [thread:$0]  (!%p3014_p6), %s3535_s9, 4096, %s451_s27, [#allocation9], %s2885_s29, %s2885_s29, %s2886_s17  }
  0x67   : > { %p2730_p11 = pneg %p2729_p9  ;;  %p2736_p13 = por %p2735_p10, %p2734_p12 }
  0x69   : > { %p2737_p0 = pnand %p2736_p13, %p2730_p11 }
  0x6b   : > { %2740 = shalt.err (!%p2737_p0)
}
  0x6c   : > { %2336 = dma.hbm_to_vmem [thread:$0]  (!%p3014_p6), %s3508_s12, 16, %s479_s3, [#allocation12]  }
  0x6d   : > { %s2752_s17 = scalar_lea.vmem %s501_s11, 16  ;;  %s2759_s30 = scalar_lea.vmem %s501_s11, 32 }
  0x6e   : > { %p2753_p2 = scmp.ne.s32.totalorder %s501_s11, %s2752_s17  ;;  %p2760_p1 = scmp.lt.s32.totalorder %s501_s11, %s501_s11 }
  0x6f   : > { %p2761_p8 = scmp.lt.s32.totalorder %s2759_s30, %s2752_s17 }
  0x70   : > { %p2755_p4 = pnand %p2753_p2, %p3022_p7 }
  0x71   : > { %p2762_p9 = por %p2761_p8, %p2760_p1 }
  0x72   : > { %p2756_p5 = pneg %p2755_p4 }
  0x74   : > { %p2763_p3 = pnand %p2762_p9, %p2756_p5 }
  0x76   : > { %2766 = shalt.err (!%p2763_p3)
}
  0x77   : > { %2342 = dma.hbm_to_vmem [thread:$0]  (!%p3014_p6), %s3510_s14, 16, %s501_s11, [#allocation15]  }
  0x78   : > { %s2043_s16 = sadd.s32 4294967294, %s2875_s21   ;;  %s3089_s28 = sadd.s32 1, %s2875_s21  }
  0x79   : > { %s39_s3 = ssub.s32 %s2875_s21, %s3089_s28  ;;  %s42_s6 = sadd.s32 1, %s2871_s20 }
  0x7a   : > { %p40_p3 = scmp.eq.s32.totalorder %s39_s3, 0  ;;  %p49_p7 = scmp.ne.s32.totalorder %s2871_s20, %s2867_s19 }
  0x7b   : > { %p50_p11 = scmp.eq.s32.totalorder %s2875_s21, 0  ;;  %p55_p12 = scmp.ne.s32.totalorder %s2867_s19, %s2863_s18 }
  0x7c   : > { %s3100_s23 = scalar_select %p40_p3, %s2871_s20, %s42_s6  }
  0x7d   : > { %p3102_p10 = por %p50_p11, %p49_p7  ;;  %p3537_p13 = scmp.eq.s32.totalorder %s3000_s24, 0 }
  0x7e   : > { %p378_p0 = scmp.eq.s32.totalorder %s3000_s24, 1  ;;  %p384_p2 = scmp.eq.s32.totalorder %s2043_s16, 1 }
  0x7f   : > { %p3108_p6 = por %p3537_p13, %p55_p12  ;;  %p2359_p4 = scmp.lt.s32.totalorder %s2875_s21, 2 }
  0x80   : > { %s511_s27 = sand.u32 1, %s2871_s20   ;;  %p3115_p5 = por %p378_p0, %p49_p7 }
  0x81   : > { %s3538_s11 = scalar_select %p3108_p6, 1, 0 }
  0x82   : > { %s3539_s29 = scalar_select %p3115_p5, 1, 0 }
  0x83   : > { %p3119_p1 = por %p384_p2, %p55_p12  ;;  %s2054_s30 = sshll.u32 %s511_s27, 4 }
  0x84   : > { %s2163_s22 = sshll.u32 %s2875_s21, 8  ;;  %s515_s16 = scalar_lea.vmem [#allocation2], %s2054_s30 }
  0x85   : > { %s3540_s17 = scalar_select %p3119_p1, 1, 0 }
  0x86   : > { %s3127_s6 = scalar_lea.hbm %s3496_s0, %s2163_s22  ;;  %s522_s5 = sshll.u32 %s515_s16, 4  ;;  %s3129_s5 = int_to_ptr.vmem [resolvable:$true] %s522_s5 }
  0x87   : > { %p3133_p8 = pnand %p2359_p4, %p3102_p10  ;;  %s3137_s8 = scalar_lea.sflag [#allocation3], %s511_s27 }
  0x88   : > { %s2767_s9 = scalar_lea.hbm %s3127_s6, 256  ;;  %s2772_s30 = scalar_lea.hbm %s3496_s0, 512 }
  0x89   : > { %p2768_p9 = scmp.ne.s32.totalorder %s3127_s6, %s2767_s9  ;;  %p2769_p3 = pneg %p3133_p8 }
  0x8a   : > { %p2773_p12 = scmp.lt.s32.totalorder %s3127_s6, %s3496_s0  ;;  %p2774_p10 = scmp.lt.s32.totalorder %s2772_s30, %s2767_s9 }
  0x8b   : > { %p2770_p7 = pnand %p2769_p3, %p2768_p9 }
  0x8c   : > { %p2775_p13 = por %p2774_p10, %p2773_p12 }
  0x8d   : > { %p2771_p11 = pneg %p2770_p7 }
  0x8f   : > { %p2776_p0 = pnand %p2775_p13, %p2771_p11 }
  0x91   : > { %2779 = shalt.err (!%p2776_p0)
}
  0x92   : > { %s2780_s26 = scalar_lea.vmem %s3129_s5, 256  ;;  %s2889_s27 = smov [#allocation2]  }
  0x93   : > { %p2781_p2 = scmp.ne.s32.totalorder %s3129_s5, %s2780_s26  ;;  %s2785_s10 = sshll.u32 %s2889_s27, 4  ;;  %s2786_s10 = int_to_ptr.vmem [resolvable:$false] %s2785_s10 }
  0x94   : > { %s2787_s22 = scalar_lea.vmem %s2786_s10, 512  ;;  %p2788_p7 = scmp.lt.s32.totalorder %s3129_s5, %s2786_s10 }
  0x95   : > { %p2783_p4 = pnand %p2781_p2, %p2769_p3  ;;  %p2789_p1 = scmp.lt.s32.totalorder %s2787_s22, %s2780_s26 }
  0x97   : > { %p2784_p9 = pneg %p2783_p4  ;;  %p2790_p5 = por %p2789_p1, %p2788_p7 }
  0x99   : > { %p2791_p6 = pnand %p2790_p5, %p2784_p9 }
  0x9b   : > { %2794 = shalt.err (!%p2791_p6)
}
  0x9c   : > { %s2890_s9 = smov 128   ;;  %s2891_s15 = smov 8  }
  0x9d   : > { %2346 = dma.hbm_to_vmem [thread:$0]  (!%p3133_p8), %s3127_s6, 256, %s3129_s5, %s3137_s8, %s2890_s9, %s2890_s9, %s2891_s15  }
  0x9e   : > { %p3542_p3 = scmp.ne.s32.totalorder %s3528_s25, 0 }
  0x9f   : > { %s3161_s30 = sand.u32 (!%p3542_p3), 1, %s2867_s19   ;;  %p3543_p6 = scmp.ne.s32.totalorder (!%p3542_p3), %s3538_s11, 0 }
  0xa0   : > { %543 = sbr.rel (%p3542_p3) target bundleno = 2829 (0xb0d), region = 80  ;;  %s2058_s10 = sshll.u32 (!%p3542_p3), %s3161_s30, 4 }
  0xa1   : > { %s546_s3 = scalar_lea.sflag (!%p3542_p3), [#allocation3], %s3161_s30  ;;  %s3167_s16 = scalar_lea.vmem (!%p3542_p3), [#allocation2], %s2058_s10 }
  0xa5   : > { %2838 = dma.done.wait (%p3543_p6), %s546_s3, 256  }
  0xa6   : > { %2840 = vsyncadd (%p3543_p6), %s546_s3, 4294967040  ;;  %p3544_p5 = scmp.eq.s32.totalorder %s3000_s24, 0 }
  0xa8   : > { %2842 = dma.done.wait (%p3544_p5), [#allocation6], 1040   ;;  %p3545_p1 = pmov %p3544_p5 }
  0xaa   : > { %2844 = vsyncadd (%p3545_p1), [#allocation6], 4294966256  ;;  %p3546_p8 = pmov %p3545_p1 }
  0xab   : > { %p3547_p11 = pmov %p3545_p1 }
  0xac   : > { %2846 = dma.done.wait (%p3546_p8), [#allocation9], 4112  }
  0xad   : > { %2848 = vsyncadd (%p3547_p11), [#allocation9], 4294963184  ;;  %p3548_p12 = pmov %p3545_p1 }
  0xae   : > { %p3549_p10 = pmov %p3545_p1 }
  0xaf   : > { %2850 = dma.done.wait (%p3548_p12), [#allocation12], 80  }
  0xb0   : > { %2852 = vsyncadd (%p3549_p10), [#allocation12], 4294967216  ;;  %p3550_p13 = pmov %p3545_p1 }
  0xb1   : > { %p3551_p0 = pmov %p3545_p1 }
  0xb2   : > { %2854 = dma.done.wait (%p3550_p13), [#allocation15], 32  }
  0xb3   : > { %2856 = vsyncadd (%p3551_p0), [#allocation15], 4294967264  ;;  %s2068_s5 = sshll.u32 %s3000_s24, 1  ;;  %v2892_v0 = vmov 0.0   ;;  %vm2893_vm0 = vmmov 0   ;;  %vm676_vm1 = vcmask 523264  }
  0xb4   : > { %2230 = vmatprep.subr.bf16.mxu1 %v2892_v0  ;;  %2234 = vmatprep.mubr.msk.bf16.mxu1 %vm2893_vm0, %v2892_v0  ;;  %p635_p2 = scmp.lt.s32.totalorder %s2068_s5, 3  ;;  %v2426_v1 = vld [vmem:[%s3498_s2 + $0x8] sm:$0xff]   ;;  %v2427_v2 = vld [vmem:[%s3498_s2] sm:$0xff]   ;;  %vm727_vm2 = vcmask 261120   ;;  %s2894_s3 = smov 64  }
  0xb5   : > { %2254 = vmatprep.subr.bf16.mxu0 %v2892_v0  ;;  %2258 = vmatprep.mubr.msk.bf16.mxu0 %vm2893_vm0, %v2892_v0  ;;  %v684_v3 = vsel %vm676_vm1, %v2426_v1, 0  ;;  %v681_v4 = vsel %vm676_vm1, %v2427_v2, 0  ;;  %v3215_v6 = vld [vmem:[%s3500_s4] ss:$0 sm:$0xff]  ;;  %s3552_s8 = sld [smem:[#allocation24_spill]]  ;;  %s2164_s26 = sshll.u32 %s3000_s24, 8 }
  0xb6   : > { %s3564_s5 = smov (!%p635_p2, %s2068_s5), 3  ;;  %2231 = vmatpush3.bf16.xpose.msra.mxu1 %v684_v3  ;;  %s3553_s27 = sld [smem:[#allocation26_spill]] }
  0xb7   : > { %s2069_s7 = sshll.u32 %s3564_s5, 2  ;;  %2232 = vmatprep.subr.bf16.mxu1 %v2892_v0  ;;  %s3554_s9 = sld [smem:[#allocation31_spill]] }
  0xb8   : > { %s638_s22 = scalar_lea.vmem %s3497_s1, %s2069_s7  ;;  %s1869_s7 = scalar_lea.sflag [#allocation4], %s3161_s30 }
  0xb9   : > { %v2428_v5 = vld [vmem:[%s638_s22] sm:$0xff]   ;;  %p3556_p9 = scmp.ne.s32.totalorder %s3539_s29, 0  ;;  %s2896_s24 = smov [#allocation17]  }
  0xbb   : > { %v2429_v25 = vld [vmem:[%s3552_s8 + $0x8] sm:$0xff]   ;;  %v2430_v26 = vld [vmem:[%s3552_s8] sm:$0xff]  }
  0xbe   : > { %2233 = vmatpush3.bf16.xpose.msra.mxu1 %v681_v4 }
  0xbf   : > { %2238 = vmatprep.subr.bf16.mxu1 %v2892_v0 }
  0xc5   : > { %2235 = vmatmul.mubr.msk.bf16.vlgmr.msra.gmra.mxu1 %vm676_vm1, %v2428_v5 }
  0xc6   : > { %2242 = vmatprep.mubr.msk.bf16.mxu1 %vm2893_vm0, %v2892_v0  ;;  %2239 = vmatpush3.bf16.msra.mxu1 %v2429_v25 }
  0xc7   : > { %2240 = vmatprep.subr.bf16.mxu1 %v2892_v0 }
  0xca   : > { %2241 = vmatpush3.bf16.msra.mxu1 %v2430_v26 }
  0xcb   : > { %2246 = vmatprep.subr.bf16.mxu1 %v2892_v0 }
 0x185   : > { %v720_v7 = vpop.f32.mrf.mxu1 }
 0x186   : > { %v721_v8 = vadd.f32 %v3215_v6, %v720_v7  ;;  %v2431_v7 = vld [vmem:[#allocation5 + $0x38] sm:$0xff]  }
 0x187   : > { %v2236_v9 = vpop.f32.mrf.mxu1 }
 0x188   : > { %v728_v10 = vsel %vm727_vm2, %v721_v8, -inf  ;;  %v2433_v9 = vld [vmem:[#allocation5 + $0x28] sm:$0xff]  }
 0x189   : > { %729 = vmax.xlane.f32.xlu0 %v728_v10  ;;  %v723_v11 = vpop.f32.mrf.mxu1  ;;  %v2434_v10 = vld [vmem:[#allocation5 + $0x20] sm:$0xff]  }
 0x18a   : > { %v724_v12 = vadd.f32 %v3215_v6, %v723_v11  ;;  %v2435_v11 = vld [vmem:[#allocation5 + $0x18] sm:$0xff]  }
 0x18b   : > { %v2237_v13 = vpop.f32.mrf.mxu1 }
 0x18c   : > { %v731_v14 = vsel %vm727_vm2, %v724_v12, -inf  ;;  %v2437_v13 = vld [vmem:[#allocation5 + $0x8] sm:$0xff]  }
 0x18d   : > { %732 = vmax.xlane.f32.xlu0 %v731_v14  ;;  %v2438_v14 = vld [vmem:[#allocation5] sm:$0xff]  }
 0x1a3   : > { %811 = vrot.lane.b32.xlu0 %v2426_v1, %s2894_s3 }
 0x212   : > { %v730_v15 = vpop.xlane.xlu0 %729 }
 0x213   : > { %v734_v16 = vsub.f32 %v721_v8, %v730_v15  ;;  %v2432_v8 = vld [vmem:[#allocation5 + $0x30] sm:$0xff]  }
 0x215   : > { %v736_v17 = vmul.f32 1.442695, %v734_v16 }
 0x216   : > { %v733_v18 = vpop.xlane.xlu0 %732 }
 0x217   : > { %2519 = vpow2.f32 %v736_v17  ;;  %v735_v19 = vsub.f32 %v724_v12, %v733_v18  ;;  %v2436_v12 = vld [vmem:[#allocation5 + $0x10] sm:$0xff]  }
 0x219   : > { %v738_v20 = vmul.f32 1.442695, %v735_v19 }
 0x21a   : > { %v812_v31 = vpop.permute.xlu0 %811 }
 0x21b   : > { %2521 = vpow2.f32 %v738_v20  ;;  %v820_v34 = vsel %vm676_vm1, %v812_v31, 0 }
 0x224   : > { %v2520_v21 = vpop.eup %2519 }
 0x225   : > { %v740_v22 = vsel %vm727_vm2, %v2520_v21, 0.0 }
 0x226   : > { %741 = vadd.xlane.f32.xlu1 %v740_v22 }
 0x228   : > { %v2522_v23 = vpop.eup %2521 }
 0x229   : > { %v743_v24 = vsel %vm727_vm2, %v2522_v23, 0.0 }
 0x22a   : > { %744 = vadd.xlane.f32.xlu1 %v743_v24 }
 0x23b   : > { %809 = vrot.lane.b32.xlu1 %v2427_v2, %s2894_s3 }
 0x23f   : > { %807 = vrot.lane.b32.xlu1 %v2428_v5, %s2894_s3 }
 0x2af   : > { %v742_v27 = vpop.xlane.xlu1 %741 }
 0x2b0   : > { %2523 = vrcp.f32 %v742_v27  ;;  %v642_v27 = vld [vmem:[%s3167_s16] sm:$0xff] }
 0x2b3   : > { %v745_v28 = vpop.xlane.xlu1 %744 }
 0x2b4   : > { %2525 = vrcp.f32 %v745_v28 }
 0x2b7   : > { %v810_v36 = vpop.permute.xlu1 %809 }
 0x2b8   : > { %v817_v37 = vsel %vm676_vm1, %v810_v36, 0  ;;  %v2439_v36 = vld [vmem:[#allocation10 + $0xe0] ss:$16 sps:$4 sm:$0xff]  }
 0x2bb   : > { %v808_v38 = vpop.permute.xlu1 %807 }
 0x2bd   : > { %v2524_v29 = vpop.eup %2523 }
 0x2be   : > { %v748_v32 = vmul.f32 %v2524_v29, %v2520_v21 }
 0x2c1   : > { %v2526_v30 = vpop.eup %2525 }
 0x2c2   : > { %v749_v33 = vmul.f32 %v2526_v30, %v2522_v23 }
 0x2c4   : > { %v750_v35 = vpack.c.bf16 %v749_v33, %v748_v32  ;;  %v643_v32 = vld [vmem:[%s3167_s16 + $0x8] sm:$0xff] }
 0x2c6   : > { %2243 = vmatmul.mubr.msk.bf16.vlgmr.msra.gmra.mxu1 %vm727_vm2, %v750_v35 }
 0x2c7   : > { %2247 = vmatpush3.bf16.xpose.msra.mxu1 %v820_v34  ;;  %2250 = vmatprep.mubr.msk.bf16.mxu1 %vm2893_vm0, %v2892_v0 }
 0x2c8   : > { %2248 = vmatprep.subr.bf16.mxu1 %v2892_v0 }
 0x2cf   : > { %2249 = vmatpush3.bf16.xpose.msra.mxu1 %v817_v37  ;;  %v2441_v37 = vld [vmem:[#allocation10 + $0xe4] ss:$16 sps:$4 sm:$0xff]  }
 0x2d0   : > { %1317 = vmatprep.subr.bf16.mxu1 %v2441_v37  ;;  %v2494_v37 = vld [vmem:[%s3554_s9 + $0xb0] sm:$0xff]  }
 0x2d6   : > { %2251 = vmatmul.mubr.msk.bf16.vlgmr.msra.gmra.mxu1 %vm676_vm1, %v808_v38  ;;  %v2442_v38 = vld [vmem:[#allocation10 + $0xe8] ss:$16 sps:$4 sm:$0xff]  }
 0x2d7   : > { %1318 = vmatpush1.bf16.msra.mxu1 %v2439_v36  ;;  %v2493_v36 = vld [vmem:[%s3554_s9 + $0x30] sm:$0xff]  }
 0x386   : > { %v3241_v39 = vpop.f32.mrf.mxu1 }
 0x388   : > { %v2244_v40 = vpop.f32.mrf.mxu1 }
 0x38a   : > { %v3243_v41 = vpop.f32.mrf.mxu1 }
 0x38c   : > { %v2245_v42 = vpop.f32.mrf.mxu1 }
 0x396   : > { %v856_v43 = vpop.f32.mrf.mxu1 }
 0x397   : > { %v857_v44 = vadd.f32 %v3215_v6, %v856_v43 }
 0x398   : > { %v2252_v45 = vpop.f32.mrf.mxu1 }
 0x399   : > { %v863_v46 = vsel %vm727_vm2, %v857_v44, -inf }
 0x39a   : > { %864 = vmax.xlane.f32.xlu1 %v863_v46  ;;  %v859_v47 = vpop.f32.mrf.mxu1 }
 0x39b   : > { %v860_v48 = vadd.f32 %v3215_v6, %v859_v47 }
 0x39c   : > { %v2253_v49 = vpop.f32.mrf.mxu1 }
 0x39d   : > { %v866_v50 = vsel %vm727_vm2, %v860_v48, -inf  ;;  %v2450_v49 = vld [vmem:[#allocation10 + $0xcc] ss:$16 sps:$4 sm:$0xff]  }
 0x39e   : > { %867 = vmax.xlane.f32.xlu0 %v866_v50  ;;  %v2445_v50 = vld [vmem:[#allocation10 + $0xc0] ss:$16 sps:$4 sm:$0xff]  }
 0x3ab   : > { %888 = vrot.lane.b32.xlu1 %v2429_v25, %s2894_s3  ;;  %v2080_v25 = vld [vmem:[%s3553_s27] ss:$0 sm:$0xff]  ;;  %s632_s27 = scalar_lea.vmem [#allocation17], %s2058_s10  ;;  %s2799_s10 = sshll.u32 %s2896_s24, 4  ;;  %s2800_s10 = int_to_ptr.vmem [resolvable:$false] %s2799_s10 }
 0x3ac   : > { %s1882_s16 = sshll.u32 %s632_s27, 4  ;;  %s2801_s11 = scalar_lea.vmem %s2800_s10, 512  ;;  %s3453_s16 = int_to_ptr.vmem [resolvable:$true] %s1882_s16 }
 0x3ad   : > { %s2795_s25 = scalar_lea.vmem %s3453_s16, 256  ;;  %p2802_p6 = scmp.lt.s32.totalorder %s3453_s16, %s2800_s10 }
 0x3ae   : > { %p2796_p4 = scmp.ne.s32.totalorder %s3453_s16, %s2795_s25  ;;  %p2803_p5 = scmp.lt.s32.totalorder %s2801_s11, %s2795_s25 }
 0x3b0   : > { %p2797_p7 = pnand %p2796_p4, %p3556_p9  ;;  %p2804_p1 = por %p2803_p5, %p2802_p6 }
 0x3b2   : > { %p2798_p3 = pneg %p2797_p7 }
 0x3b4   : > { %p2805_p8 = pnand %p2804_p1, %p2798_p3 }
 0x423   : > { %v865_v51 = vpop.xlane.xlu1 %864 }
 0x424   : > { %v869_v52 = vsub.f32 %v857_v44, %v865_v51  ;;  %v2448_v51 = vld [vmem:[#allocation10 + $0xc8] ss:$16 sps:$4 sm:$0xff]  }
 0x426   : > { %v871_v53 = vmul.f32 1.442695, %v869_v52  ;;  %v2453_v52 = vld [vmem:[#allocation10 + $0xa4] ss:$16 sps:$4 sm:$0xff]  }
 0x427   : > { %v868_v54 = vpop.xlane.xlu0 %867  ;;  %v889_v61 = vpop.permute.xlu1 %888 }
 0x428   : > { %2527 = vpow2.f32 %v871_v53  ;;  %v870_v55 = vsub.f32 %v860_v48, %v868_v54  ;;  %2255 = vmatpush3.bf16.msra.mxu0 %v889_v61  ;;  %v2447_v48 = vld [vmem:[#allocation10 + $0xc4] ss:$16 sps:$4 sm:$0xff]   ;;  %v2456_v53 = vld [vmem:[#allocation10 + $0xac] ss:$16 sps:$4 sm:$0xff]   ;;  %v2451_v54 = vld [vmem:[#allocation10 + $0xa0] ss:$16 sps:$4 sm:$0xff]  }
 0x429   : > { %2256 = vmatprep.subr.bf16.mxu0 %v2892_v0  ;;  %1319 = vmatprep.subr.bf16.mxu1 %v2447_v48  ;;  %v2468_v61 = vld [vmem:[#allocation10 + $0x6c] ss:$16 sps:$4 sm:$0xff]   ;;  %v2505_v48 = vld [vmem:[%s3554_s9 + $0x18] sm:$0xff]  }
 0x42a   : > { %v873_v56 = vmul.f32 1.442695, %v870_v55  ;;  %1320 = vmatpush1.bf16.msra.mxu1 %v2445_v50  ;;  %v2454_v55 = vld [vmem:[#allocation10 + $0xa8] ss:$16 sps:$4 sm:$0xff]   ;;  %v2507_v50 = vld [vmem:[%s3554_s9 + $0x50] sm:$0xff]  }
 0x42b   : > { %1321 = vmatprep.subr.bf16.mxu1 %v2453_v52  ;;  %v2509_v52 = vld [vmem:[%s3554_s9 + $0x10] sm:$0xff]  }
 0x42c   : > { %2529 = vpow2.f32 %v873_v56  ;;  %v2457_v56 = vld [vmem:[#allocation10 + $0x80] ss:$16 sps:$4 sm:$0xff]  }
 0x42e   : > { %1322 = vmatpush1.bf16.msra.mxu1 %v2451_v54  ;;  %v2511_v54 = vld [vmem:[%s3554_s9 + $0x48] sm:$0xff]  }
 0x435   : > { %v2528_v57 = vpop.eup %2527 }
 0x436   : > { %v875_v58 = vsel %vm727_vm2, %v2528_v57, 0.0 }
 0x437   : > { %876 = vadd.xlane.f32.xlu0 %v875_v58  ;;  %v2460_v58 = vld [vmem:[#allocation10 + $0x88] ss:$16 sps:$4 sm:$0xff]  }
 0x439   : > { %v2530_v59 = vpop.eup %2529 }
 0x43a   : > { %v878_v60 = vsel %vm727_vm2, %v2530_v59, 0.0 }
 0x43b   : > { %879 = vadd.xlane.f32.xlu0 %v878_v60  ;;  %v2465_v60 = vld [vmem:[#allocation10 + $0x64] ss:$16 sps:$4 sm:$0xff]  }
 0x451   : > { %886 = vrot.lane.b32.xlu0 %v2430_v26, %s2894_s3 }
 0x4c0   : > { %v877_v62 = vpop.xlane.xlu0 %876 }
 0x4c1   : > { %2531 = vrcp.f32 %v877_v62  ;;  %v2463_v62 = vld [vmem:[#allocation10 + $0x60] ss:$16 sps:$4 sm:$0xff]  }
 0x4c4   : > { %v880_v63 = vpop.xlane.xlu0 %879 }
 0x4c5   : > { %2533 = vrcp.f32 %v880_v63  ;;  %v2466_v63 = vld [vmem:[#allocation10 + $0x68] ss:$16 sps:$4 sm:$0xff]  }
 0x4c8   : > { %v887_v1 = vpop.permute.xlu0 %886 }
 0x4c9   : > { %2257 = vmatpush3.bf16.msra.mxu0 %v887_v1  ;;  %v2471_v1 = vld [vmem:[#allocation10 + $0x44] ss:$16 sps:$4 sm:$0xff]  }
 0x4ca   : > { %2262 = vmatprep.subr.bf16.mxu0 %v2892_v0 }
 0x4ce   : > { %v2532_v2 = vpop.eup %2531 }
 0x4cf   : > { %v883_v4 = vmul.f32 %v2532_v2, %v2528_v57  ;;  %v2459_v57 = vld [vmem:[#allocation10 + $0x84] ss:$16 sps:$4 sm:$0xff]   ;;  %v2474_v2 = vld [vmem:[#allocation10 + $0x4c] ss:$16 sps:$4 sm:$0xff]  }
 0x4d0   : > { %1323 = vmatprep.subr.bf16.mxu1 %v2459_v57  ;;  %v2514_v57 = vld [vmem:[%s3554_s9 + $0x88] sm:$0xff]  }
 0x4d1   : > { %1324 = vmatpush1.bf16.msra.mxu1 %v2457_v56  ;;  %v2513_v56 = vld [vmem:[%s3554_s9 + $0x8] sm:$0xff]  }
 0x4d2   : > { %v2534_v3 = vpop.eup %2533  ;;  %1325 = vmatprep.subr.bf16.mxu1 %v2465_v60  ;;  %v2517_v60 = vld [vmem:[%s3554_s9] sm:$0xff]  }
 0x4d3   : > { %v884_v5 = vmul.f32 %v2534_v3, %v2530_v59  ;;  %v2462_v59 = vld [vmem:[#allocation10 + $0x8c] ss:$16 sps:$4 sm:$0xff]   ;;  %v2469_v3 = vld [vmem:[#allocation10 + $0x40] ss:$16 sps:$4 sm:$0xff]  }
 0x4d5   : > { %v885_v6 = vpack.c.bf16 %v884_v5, %v883_v4  ;;  %1326 = vmatpush1.bf16.msra.mxu1 %v2463_v62  ;;  %v2895_v4 = vmov 0   ;;  %v2472_v5 = vld [vmem:[#allocation10 + $0x48] ss:$16 sps:$4 sm:$0xff]   ;;  %v1137_v62 = vlaneseq }
 0x4d6   : > { %1349 = vmatprep.mubr.bf16.mxu1 %v2895_v4  ;;  %1327 = vmatprep.subr.bf16.mxu1 %v2471_v1 }
 0x4d7   : > { %2259 = vmatmul.mubr.msk.bf16.vlgmr.msra.gmra.mxu0 %vm727_vm2, %v885_v6  ;;  %v2477_v6 = vld [vmem:[#allocation10 + $0x24] ss:$16 sps:$4 sm:$0xff]  }
 0x4d8   : > { %2278 = vmatprep.mubr.msk.bf16.mxu0 %vm2893_vm0, %v2892_v0  ;;  %2263 = vmatpush3.bf16.msra.mxu0 %v2431_v7  ;;  %v2480_v7 = vld [vmem:[#allocation10 + $0x2c] ss:$16 sps:$4 sm:$0xff]  }
 0x4d9   : > { %2264 = vmatprep.subr.bf16.mxu0 %v2892_v0  ;;  %1328 = vmatpush1.bf16.msra.mxu1 %v2469_v3  ;;  %v1135_v3 = vld [vmem:[#allocation11] sm:$0xf] }
 0x4da   : > { %1329 = vmatprep.subr.bf16.mxu1 %v2477_v6 }
 0x4dc   : > { %2265 = vmatpush3.bf16.msra.mxu0 %v2432_v8  ;;  %v2475_v8 = vld [vmem:[#allocation10 + $0x20] ss:$16 sps:$4 sm:$0xff]  }
 0x4dd   : > { %2266 = vmatprep.subr.bf16.mxu0 %v2892_v0  ;;  %1330 = vmatpush1.bf16.msra.mxu1 %v2475_v8 }
 0x4e0   : > { %2267 = vmatpush3.bf16.msra.mxu0 %v2433_v9  ;;  %v2478_v9 = vld [vmem:[#allocation10 + $0x28] ss:$16 sps:$4 sm:$0xff]  }
 0x4e1   : > { %2268 = vmatprep.subr.bf16.mxu0 %v2892_v0 }
 0x4e4   : > { %2269 = vmatpush3.bf16.msra.mxu0 %v2434_v10  ;;  %v2483_v10 = vld [vmem:[#allocation10 + $0x4] ss:$16 sps:$4 sm:$0xff]  }
 0x4e5   : > { %2270 = vmatprep.subr.bf16.mxu0 %v2892_v0  ;;  %1331 = vmatprep.subr.bf16.mxu1 %v2483_v10 }
 0x4e8   : > { %2271 = vmatpush3.bf16.msra.mxu0 %v2435_v11  ;;  %v2486_v11 = vld [vmem:[#allocation10 + $0xc] ss:$16 sps:$4 sm:$0xff]  }
 0x4e9   : > { %2272 = vmatprep.subr.bf16.mxu0 %v2892_v0 }
 0x4ec   : > { %2273 = vmatpush3.bf16.msra.mxu0 %v2436_v12  ;;  %v2481_v12 = vld [vmem:[#allocation10] ss:$16 sps:$4 sm:$0xff]  }
 0x4ed   : > { %2274 = vmatprep.subr.bf16.mxu0 %v2892_v0  ;;  %1332 = vmatpush1.bf16.msra.mxu1 %v2481_v12 }
 0x4f0   : > { %2275 = vmatpush3.bf16.msra.mxu0 %v2437_v13  ;;  %v2484_v13 = vld [vmem:[#allocation10 + $0x8] ss:$16 sps:$4 sm:$0xff]  }
 0x4f1   : > { %2276 = vmatprep.subr.bf16.mxu0 %v2892_v0 }
 0x4f4   : > { %2277 = vmatpush3.bf16.msra.mxu0 %v2438_v14 }
 0x597   : > { %v929_v15 = vpop.f32.mrf.mxu0 }
 0x599   : > { %v2260_v16 = vpop.f32.mrf.mxu0 }
 0x59b   : > { %v932_v17 = vpop.f32.mrf.mxu0 }
 0x59c   : > { %v2421_v18 = vpack.i.bf16 %v932_v17, %v929_v15 }
 0x59d   : > { %v2261_v19 = vpop.f32.mrf.mxu0 }
 0x59e   : > { %2422 = vrot.lane.b32.xlu1 %v2421_v18, %s2894_s3  ;;  %s3555_s3 = sld [smem:[#allocation32_spill]] }
 0x5a4   : > { %s3451_s5 = scalar_lea.hbm %s3555_s3, %s2164_s26 }
 0x610   : > { %v2423_v20 = vpop.permute.xlu1 %2422 }
 0x611   : > { %v2425_v21 = vunpack.i.h.bf16 %v2423_v20  ;;  %v2424_v22 = vunpack.i.l.bf16 %v2423_v20 }
 0x613   : > { %v945_v23 = vsel %vm676_vm1, %v3243_v41, %v2425_v21  ;;  %v944_v0 = vsel %vm676_vm1, %v3241_v39, %v2424_v22  ;;  %v2444_v39 = vld [vmem:[#allocation10 + $0xec] ss:$16 sps:$4 sm:$0xff]  }
 0x614   : > { %v946_v24 = vpack.c.bf16 %v945_v23, %v944_v0  ;;  %1360 = vmatprep.subr.bf16.mxu0 %v2444_v39  ;;  %v2089_v22 = vld [vmem:[#allocation7] ss:$0 sm:$0xff]  ;;  %v2496_v39 = vld [vmem:[%s3554_s9 + $0xe8] sm:$0xff]  }
 0x616   : > { %2279 = vmatmul.mubr.bf16.vlgmr.msra.gmra.mxu0 %v946_v24 }
 0x617   : > { %1361 = vmatpush1.bf16.msra.mxu0 %v2442_v38  ;;  %1392 = vmatprep.mubr.bf16.mxu0 %v2895_v4  ;;  %v2495_v38 = vld [vmem:[%s3554_s9 + $0x68] sm:$0xff]  }
 0x618   : > { %1362 = vmatprep.subr.bf16.mxu0 %v2450_v49  ;;  %v2506_v49 = vld [vmem:[%s3554_s9 + $0x98] sm:$0xff]  }
 0x61b   : > { %1363 = vmatpush1.bf16.msra.mxu0 %v2448_v51  ;;  %v2508_v51 = vld [vmem:[%s3554_s9 + $0xd0] sm:$0xff]  }
 0x61c   : > { %1364 = vmatprep.subr.bf16.mxu0 %v2456_v53  ;;  %v2510_v53 = vld [vmem:[%s3554_s9 + $0x90] sm:$0xff]  }
 0x61f   : > { %1365 = vmatpush1.bf16.msra.mxu0 %v2454_v55  ;;  %v2512_v55 = vld [vmem:[%s3554_s9 + $0xc8] sm:$0xff]  }
 0x620   : > { %1366 = vmatprep.subr.bf16.mxu0 %v2462_v59  ;;  %v2516_v59 = vld [vmem:[%s3554_s9 + $0xc0] sm:$0xff]  }
 0x623   : > { %1367 = vmatpush1.bf16.msra.mxu0 %v2460_v58  ;;  %v2515_v58 = vld [vmem:[%s3554_s9 + $0x40] sm:$0xff]  }
 0x624   : > { %1368 = vmatprep.subr.bf16.mxu0 %v2468_v61  ;;  %v2518_v61 = vld [vmem:[%s3554_s9 + $0x80] sm:$0xff]  }
 0x627   : > { %1369 = vmatpush1.bf16.msra.mxu0 %v2466_v63  ;;  %v1138_v63 = vshrl.u32 %v1137_v62, 7 }
 0x628   : > { %1370 = vmatprep.subr.bf16.mxu0 %v2474_v2 }
 0x629   : > { %v1139_v1 = vsub.s32 0, %v1138_v63  ;;  %v1147_v2 = vsub.s32 2, %v1138_v63  ;;  %v1143_v4 = vsub.s32 1, %v1138_v63 }
 0x62b   : > { %1371 = vmatpush1.bf16.msra.mxu0 %v2472_v5  ;;  %v1151_v5 = vsub.s32 3, %v1138_v63  ;;  %v1140_v6 = vrot.slane %v1135_v3, %v1139_v1  ;;  %v1144_v8 = vrot.slane %v1135_v3, %v1143_v4 }
 0x62c   : > { %1372 = vmatprep.subr.bf16.mxu0 %v2480_v7  ;;  %v1148_v7 = vrot.slane %v1135_v3, %v1147_v2 }
 0x62f   : > { %1373 = vmatpush1.bf16.msra.mxu0 %v2478_v9  ;;  %v1152_v9 = vrot.slane %v1135_v3, %v1151_v5 }
 0x630   : > { %1374 = vmatprep.subr.bf16.mxu0 %v2486_v11 }
 0x633   : > { %1375 = vmatpush1.bf16.msra.mxu0 %v2484_v13 }
 0x6d6   : > { %v1052_v26 = vpop.f32.mrf.mxu0 }
 0x6d7   : > { %v1053_v28 = vadd.f32 %v2080_v25, %v1052_v26 }
 0x6d8   : > { %v2280_v29 = vpop.f32.mrf.mxu0 }
 0x6d9   : > { %v1059_v30 = vadd.f32 %v1053_v28, %v642_v27 }
 0x6da   : > { %v1055_v31 = vpop.f32.mrf.mxu0 }
 0x6db   : > { %v1056_v33 = vadd.f32 %v2080_v25, %v1055_v31  ;;  %1063 = vadd.xlane.f32.xlu1 %v1059_v30  ;;  %v2090_v25 = vld [vmem:[#allocation8] ss:$0 sm:$0xff]  ;;  %v2488_v31 = vld [vmem:[%s3554_s9 + $0xf8] sm:$0xff]  }
 0x6dc   : > { %v2281_v34 = vpop.f32.mrf.mxu0  ;;  %2208 = vmatprep.subr.bf16.mxu0 %v2488_v31 }
 0x6dd   : > { %v1060_v35 = vadd.f32 %v1056_v33, %v643_v32  ;;  %v2489_v32 = vld [vmem:[%s3554_s9 + $0x38] sm:$0xff]   ;;  %v2491_v34 = vld [vmem:[%s3554_s9 + $0x70] sm:$0xff]  }
 0x6de   : > { %v2490_v33 = vld [vmem:[%s3554_s9 + $0xb8] sm:$0xff]  }
 0x6df   : > { %1065 = vadd.xlane.f32.xlu0 %v1060_v35 }
 0x764   : > { %v1064_v40 = vpop.xlane.xlu1 %1063 }
 0x765   : > { %v1068_v41 = vmul.f32 0.0078125, %v1064_v40  ;;  %v2497_v40 = vld [vmem:[%s3554_s9 + $0x28] sm:$0xff]  }
 0x767   : > { %v3275_v42 = vsub.f32 %v1059_v30, %v1068_v41  ;;  %v2487_v30 = vld [vmem:[%s3554_s9 + $0x78] sm:$0xff]   ;;  %v2498_v41 = vld [vmem:[%s3554_s9 + $0xa8] sm:$0xff]  }
 0x768   : > { %v1066_v43 = vpop.xlane.xlu0 %1065  ;;  %2186 = vmatprep.subr.bf16.mxu1 %v2487_v30 }
 0x769   : > { %v1069_v44 = vmul.f32 0.0078125, %v1066_v43  ;;  %v1072_v45 = vmul.f32 %v3275_v42, %v3275_v42  ;;  %v2500_v43 = vld [vmem:[%s3554_s9 + $0xe0] sm:$0xff]  }
 0x76b   : > { %v3279_v46 = vsub.f32 %v1060_v35, %v1069_v44  ;;  %1074 = vadd.xlane.f32.xlu0 %v1072_v45  ;;  %v2492_v35 = vld [vmem:[%s3554_s9 + $0xf0] sm:$0xff]   ;;  %v2501_v44 = vld [vmem:[%s3554_s9 + $0x20] sm:$0xff]  }
 0x76c   : > { %v2502_v45 = vld [vmem:[%s3554_s9 + $0xa0] sm:$0xff]  }
 0x76d   : > { %v1073_v47 = vmul.f32 %v3279_v46, %v3279_v46 }
 0x76f   : > { %1076 = vadd.xlane.f32.xlu1 %v1073_v47  ;;  %v2504_v47 = vld [vmem:[%s3554_s9 + $0xd8] sm:$0xff]  }
 0x7f4   : > { %v1075_v14 = vpop.xlane.xlu0 %1074 }
 0x7f5   : > { %v1078_v15 = vmul.f32 0.0078125, %v1075_v14 }
 0x7f7   : > { %v1080_v16 = vadd.f32 1e-12, %v1078_v15 }
 0x7f8   : > { %v1077_v17 = vpop.xlane.xlu1 %1076 }
 0x7f9   : > { %2535 = vrsqrt.f32 %v1080_v16  ;;  %v1079_v18 = vmul.f32 0.0078125, %v1077_v17 }
 0x7fb   : > { %v1081_v19 = vadd.f32 1e-12, %v1079_v18 }
 0x7fd   : > { %2537 = vrsqrt.f32 %v1081_v19 }
 0x806   : > { %v2536_v20 = vpop.eup %2535 }
 0x807   : > { %v1084_v21 = vmul.f32 %v2536_v20, %v3275_v42  ;;  %v2499_v42 = vld [vmem:[%s3554_s9 + $0x60] sm:$0xff]  }
 0x809   : > { %v1092_v24 = vmul.f32 %v2089_v22, %v1084_v21 }
 0x80a   : > { %v2538_v23 = vpop.eup %2537 }
 0x80b   : > { %v1085_v0 = vmul.f32 %v2538_v23, %v3279_v46  ;;  %v3285_v27 = vadd.f32 %v2090_v25, %v1092_v24  ;;  %v2503_v46 = vld [vmem:[%s3554_s9 + $0x58] sm:$0xff]  }
 0x80d   : > { %v1093_v26 = vmul.f32 %v2089_v22, %v1085_v0 }
 0x80f   : > { %v3287_v28 = vadd.f32 %v2090_v25, %v1093_v26 }
 0x811   : > { %v1102_v29 = vpack.c.bf16 %v3287_v28, %v3285_v27 }
 0x813   : > { %1350 = vmatmul.mubr.bf16.vlgmr.msra.gmra.mxu1 %v1102_v29  ;;  %1393 = vmatmul.mubr.bf16.vlgmr.msra.gmra.mxu0 %v1102_v29 }
 0x814   : > { %2187 = vmatpush3.bf16.msra.mxu1 %v2489_v32  ;;  %2209 = vmatpush3.bf16.msra.mxu0 %v2490_v33 }
 0x815   : > { %2188 = vmatprep.subr.bf16.mxu1 %v2491_v34  ;;  %2210 = vmatprep.subr.bf16.mxu0 %v2492_v35 }
 0x818   : > { %2189 = vmatpush3.bf16.msra.mxu1 %v2493_v36  ;;  %2211 = vmatpush3.bf16.msra.mxu0 %v2494_v37 }
 0x819   : > { %2190 = vmatprep.subr.bf16.mxu1 %v2495_v38  ;;  %2212 = vmatprep.subr.bf16.mxu0 %v2496_v39 }
 0x81c   : > { %2191 = vmatpush3.bf16.msra.mxu1 %v2497_v40  ;;  %2213 = vmatpush3.bf16.msra.mxu0 %v2498_v41 }
 0x81d   : > { %2192 = vmatprep.subr.bf16.mxu1 %v2499_v42  ;;  %2214 = vmatprep.subr.bf16.mxu0 %v2500_v43 }
 0x820   : > { %2193 = vmatpush3.bf16.msra.mxu1 %v2501_v44  ;;  %2215 = vmatpush3.bf16.msra.mxu0 %v2502_v45 }
 0x821   : > { %2194 = vmatprep.subr.bf16.mxu1 %v2503_v46  ;;  %2216 = vmatprep.subr.bf16.mxu0 %v2504_v47 }
 0x824   : > { %2195 = vmatpush3.bf16.msra.mxu1 %v2505_v48  ;;  %2217 = vmatpush3.bf16.msra.mxu0 %v2506_v49 }
 0x825   : > { %2196 = vmatprep.subr.bf16.mxu1 %v2507_v50  ;;  %2218 = vmatprep.subr.bf16.mxu0 %v2508_v51 }
 0x828   : > { %2197 = vmatpush3.bf16.msra.mxu1 %v2509_v52  ;;  %2219 = vmatpush3.bf16.msra.mxu0 %v2510_v53 }
 0x829   : > { %2198 = vmatprep.subr.bf16.mxu1 %v2511_v54  ;;  %2220 = vmatprep.subr.bf16.mxu0 %v2512_v55 }
 0x82c   : > { %2199 = vmatpush3.bf16.msra.mxu1 %v2513_v56  ;;  %2221 = vmatpush3.bf16.msra.mxu0 %v2514_v57 }
 0x82d   : > { %2200 = vmatprep.subr.bf16.mxu1 %v2515_v58  ;;  %2222 = vmatprep.subr.bf16.mxu0 %v2516_v59 }
 0x830   : > { %2201 = vmatpush3.bf16.msra.mxu1 %v2517_v60  ;;  %2223 = vmatpush3.bf16.msra.mxu0 %v2518_v61 }
 0x8d3   : > { %v1351_v10 = vpop.f32.mrf.mxu1  ;;  %v1394_v11 = vpop.f32.mrf.mxu0 }
 0x8d4   : > { %v3387_v12 = vadd.f32 %v1351_v10, %v1140_v6  ;;  %v3389_v13 = vadd.f32 %v1394_v11, %v1148_v7 }
 0x8d5   : > { %v1353_v14 = vpop.f32.mrf.mxu1  ;;  %v1396_v15 = vpop.f32.mrf.mxu0 }
 0x8d6   : > { %v1403_v16 = vmul.f32 %v3387_v12, %v3387_v12  ;;  %v1405_v17 = vmul.f32 %v3389_v13, %v3389_v13  ;;  %v3395_v18 = vadd.f32 %v1353_v14, %v1144_v8  ;;  %v3397_v19 = vadd.f32 %v1396_v15, %v1152_v9 }
 0x8d7   : > { %v1355_v20 = vpop.f32.mrf.mxu1  ;;  %v1398_v21 = vpop.f32.mrf.mxu0 }
 0x8d8   : > { %v1411_v22 = vmul.f32 %v1403_v16, %v3387_v12  ;;  %v1413_v23 = vmul.f32 %v1405_v17, %v3389_v13  ;;  %v1404_v0 = vmul.f32 %v3395_v18, %v3395_v18  ;;  %v1406_v24 = vmul.f32 %v3397_v19, %v3397_v19 }
 0x8d9   : > { %v3405_v25 = vadd.f32 %v1355_v20, %v1140_v6  ;;  %v3407_v26 = vadd.f32 %v1398_v21, %v1148_v7  ;;  %v1357_v29 = vpop.f32.mrf.mxu1  ;;  %v1400_v30 = vpop.f32.mrf.mxu0 }
 0x8da   : > { %v1419_v31 = vmul.f32 0.044715, %v1411_v22  ;;  %v1421_v32 = vmul.f32 0.044715, %v1413_v23  ;;  %v1412_v33 = vmul.f32 %v1404_v0, %v3395_v18  ;;  %v1414_v34 = vmul.f32 %v1406_v24, %v3397_v19 }
 0x8db   : > { %v1407_v35 = vmul.f32 %v3405_v25, %v3405_v25  ;;  %v1409_v36 = vmul.f32 %v3407_v26, %v3407_v26  ;;  %v3415_v37 = vadd.f32 %v1357_v29, %v1144_v8  ;;  %v3417_v38 = vadd.f32 %v1400_v30, %v1152_v9 }
 0x8dc   : > { %v1427_v39 = vadd.f32 %v1419_v31, %v3387_v12  ;;  %v1429_v40 = vadd.f32 %v1421_v32, %v3389_v13  ;;  %v1420_v41 = vmul.f32 0.044715, %v1412_v33  ;;  %v1422_v42 = vmul.f32 0.044715, %v1414_v34 }
 0x8dd   : > { %v1415_v43 = vmul.f32 %v1407_v35, %v3405_v25  ;;  %v1417_v44 = vmul.f32 %v1409_v36, %v3407_v26  ;;  %v1408_v45 = vmul.f32 %v3415_v37, %v3415_v37  ;;  %v1410_v46 = vmul.f32 %v3417_v38, %v3417_v38 }
 0x8de   : > { %v1435_v47 = vmul.f32 0.7978846, %v1427_v39  ;;  %v1437_v48 = vmul.f32 0.7978846, %v1429_v40  ;;  %v1428_v49 = vadd.f32 %v1420_v41, %v3395_v18  ;;  %v1430_v50 = vadd.f32 %v1422_v42, %v3397_v19 }
 0x8df   : > { %v1423_v51 = vmul.f32 0.044715, %v1415_v43  ;;  %v1425_v52 = vmul.f32 0.044715, %v1417_v44  ;;  %v1416_v53 = vmul.f32 %v1408_v45, %v3415_v37  ;;  %v1418_v54 = vmul.f32 %v1410_v46, %v3417_v38 }
 0x8e0   : > { %2539 = vtanh.f32 %v1435_v47  ;;  %v1436_v55 = vmul.f32 0.7978846, %v1428_v49  ;;  %v1438_v56 = vmul.f32 0.7978846, %v1430_v50 }
 0x8e1   : > { %2541 = vtanh.f32 %v1437_v48  ;;  %v1431_v57 = vadd.f32 %v1423_v51, %v3405_v25  ;;  %v1433_v58 = vadd.f32 %v1425_v52, %v3407_v26  ;;  %v1424_v59 = vmul.f32 0.044715, %v1416_v53  ;;  %v2123_v48 = vld [vmem:[#allocation13] ss:$0 sm:$0xff] }
 0x8e2   : > { %2543 = vtanh.f32 %v1436_v55  ;;  %v1426_v60 = vmul.f32 0.044715, %v1418_v54 }
 0x8e3   : > { %2545 = vtanh.f32 %v1438_v56  ;;  %v1439_v61 = vmul.f32 0.7978846, %v1431_v57  ;;  %v1441_v62 = vmul.f32 0.7978846, %v1433_v58  ;;  %v1432_v63 = vadd.f32 %v1424_v59, %v3415_v37 }
 0x8e4   : > { %v1434_v1 = vadd.f32 %v1426_v60, %v3417_v38 }
 0x8e5   : > { %2547 = vtanh.f32 %v1439_v61  ;;  %v1440_v2 = vmul.f32 0.7978846, %v1432_v63 }
 0x8e6   : > { %2549 = vtanh.f32 %v1441_v62  ;;  %v1442_v3 = vmul.f32 0.7978846, %v1434_v1 }
 0x8e7   : > { %2551 = vtanh.f32 %v1440_v2 }
 0x8e8   : > { %2553 = vtanh.f32 %v1442_v3 }
 0x8ed   : > { %v2540_v4 = vpop.eup %2539 }
 0x8ee   : > { %v2542_v5 = vpop.eup %2541  ;;  %v1451_v10 = vadd.f32 1.0, %v2540_v4 }
 0x8ef   : > { %v2544_v6 = vpop.eup %2543  ;;  %v1453_v15 = vadd.f32 1.0, %v2542_v5 }
 0x8f0   : > { %v2546_v7 = vpop.eup %2545  ;;  %v1452_v8 = vadd.f32 1.0, %v2544_v6  ;;  %v1459_v24 = vmul.f32 0.5, %v1451_v10  ;;  %v2156_v10 = vld [vmem:[#allocation14] ss:$0 sm:$0xff] }
 0x8f1   : > { %v1454_v11 = vadd.f32 1.0, %v2546_v7  ;;  %v1461_v32 = vmul.f32 0.5, %v1453_v15 }
 0x8f2   : > { %v2548_v9 = vpop.eup %2547  ;;  %v1460_v0 = vmul.f32 0.5, %v1452_v8  ;;  %v1467_v41 = vmul.f32 %v1459_v24, %v3387_v12 }
 0x8f3   : > { %v2550_v14 = vpop.eup %2549  ;;  %v1455_v16 = vadd.f32 1.0, %v2548_v9  ;;  %v1462_v31 = vmul.f32 0.5, %v1454_v11  ;;  %v1469_v44 = vmul.f32 %v1461_v32, %v3389_v13 }
 0x8f4   : > { %v2552_v17 = vpop.eup %2551  ;;  %v1457_v20 = vadd.f32 1.0, %v2550_v14  ;;  %v1468_v39 = vmul.f32 %v1460_v0, %v3395_v18  ;;  %v2157_v14 = vld [vmem:[#allocation16] ss:$0 sm:$0xff] }
 0x8f5   : > { %v2554_v21 = vpop.eup %2553  ;;  %v1463_v22 = vmul.f32 0.5, %v1455_v16  ;;  %v1456_v23 = vadd.f32 1.0, %v2552_v17  ;;  %v1470_v42 = vmul.f32 %v1462_v31, %v3397_v19 }
 0x8f6   : > { %v1465_v29 = vmul.f32 0.5, %v1457_v20  ;;  %v1458_v30 = vadd.f32 1.0, %v2554_v21 }
 0x8f7   : > { %v1464_v33 = vmul.f32 0.5, %v1456_v23  ;;  %v1471_v34 = vmul.f32 %v1463_v22, %v3405_v25 }
 0x8f8   : > { %v1466_v35 = vmul.f32 0.5, %v1458_v30  ;;  %v1473_v36 = vmul.f32 %v1465_v29, %v3407_v26 }
 0x8f9   : > { %v1472_v40 = vmul.f32 %v1464_v33, %v3415_v37  ;;  %v1475_v47 = vpack.c.bf16 %v1471_v34, %v1467_v41 }
 0x8fa   : > { %v1474_v43 = vmul.f32 %v1466_v35, %v3417_v38  ;;  %v1477_v25 = vpack.c.bf16 %v1473_v36, %v1469_v44 }
 0x8fb   : > { %v1476_v45 = vpack.c.bf16 %v1472_v40, %v1468_v39 }
 0x8fc   : > { %v1478_v46 = vpack.c.bf16 %v1474_v43, %v1470_v42 }
 0x8fd   : > { %1774 = vmatprep.mubr.bf16.mxu1 %v1476_v45 }
 0x8fe   : > { %1815 = vmatprep.mubr.bf16.mxu0 %v1478_v46  ;;  %1775 = vmatmul.mubr.bf16.vlgmr.msra.gmra.mxu1 %v1475_v47 }
 0x8ff   : > { %1816 = vmatmul.mubr.bf16.vlgmr.msra.gmra.mxu0 %v1477_v25 }
 0x9be   : > { %v2202_v26 = vpop.f32.mrf.mxu1 }
 0x9bf   : > { %v2224_v18 = vpop.f32.mrf.mxu0 }
 0x9c0   : > { %v2203_v37 = vpop.f32.mrf.mxu1 }
 0x9c1   : > { %v2204_v49 = vadd.f32 %v2203_v37, %v2202_v26  ;;  %v2225_v12 = vpop.f32.mrf.mxu0 }
 0x9c2   : > { %v2205_v50 = vpop.f32.mrf.mxu1  ;;  %v2226_v51 = vadd.f32 %v2225_v12, %v2224_v18 }
 0x9c3   : > { %v1777_v19 = vadd.f32 %v2204_v49, %v2123_v48  ;;  %v2227_v38 = vpop.f32.mrf.mxu0 }
 0x9c4   : > { %v2206_v52 = vpop.f32.mrf.mxu1 }
 0x9c5   : > { %v1818_v13 = vadd.f32 %v2226_v51, %v1777_v19  ;;  %v2207_v53 = vadd.f32 %v2206_v52, %v2205_v50  ;;  %v2228_v54 = vpop.f32.mrf.mxu0 }
 0x9c6   : > { %v2229_v56 = vadd.f32 %v2228_v54, %v2227_v38 }
 0x9c7   : > { %v1780_v55 = vadd.f32 %v2207_v53, %v2123_v48  ;;  %v1824_v57 = vadd.f32 %v1818_v13, %v3285_v27 }
 0x9c9   : > { %v1821_v58 = vadd.f32 %v2229_v56, %v1780_v55  ;;  %1828 = vadd.xlane.f32.xlu0 %v1824_v57 }
 0x9cb   : > { %v1825_v59 = vadd.f32 %v1821_v58, %v3287_v28 }
 0x9cd   : > { %1830 = vadd.xlane.f32.xlu1 %v1825_v59 }
 0xa52   : > { %v1829_v60 = vpop.xlane.xlu0 %1828 }
 0xa53   : > { %v1832_v61 = vmul.f32 0.0078125, %v1829_v60 }
 0xa55   : > { %v1834_v62 = vsub.f32 %v1824_v57, %v1832_v61 }
 0xa56   : > { %v1831_v63 = vpop.xlane.xlu1 %1830 }
 0xa57   : > { %v1833_v1 = vmul.f32 0.0078125, %v1831_v63  ;;  %v1836_v2 = vmul.f32 %v1834_v62, %v1834_v62 }
 0xa59   : > { %v1835_v3 = vsub.f32 %v1825_v59, %v1833_v1  ;;  %1838 = vadd.xlane.f32.xlu0 %v1836_v2 }
 0xa5b   : > { %v1837_v4 = vmul.f32 %v1835_v3, %v1835_v3 }
 0xa5d   : > { %1840 = vadd.xlane.f32.xlu1 %v1837_v4 }
 0xae2   : > { %v1839_v5 = vpop.xlane.xlu0 %1838 }
 0xae3   : > { %v1842_v6 = vmul.f32 0.0078125, %v1839_v5 }
 0xae5   : > { %v1844_v27 = vadd.f32 1e-12, %v1842_v6 }
 0xae6   : > { %v1841_v7 = vpop.xlane.xlu1 %1840 }
 0xae7   : > { %2555 = vrsqrt.f32 %v1844_v27  ;;  %v1843_v8 = vmul.f32 0.0078125, %v1841_v7 }
 0xae9   : > { %v1845_v28 = vadd.f32 1e-12, %v1843_v8 }
 0xaeb   : > { %2557 = vrsqrt.f32 %v1845_v28 }
 0xaf4   : > { %v2556_v9 = vpop.eup %2555 }
 0xaf5   : > { %v1848_v11 = vmul.f32 %v2556_v9, %v1834_v62 }
 0xaf7   : > { %v1856_v15 = vmul.f32 %v2156_v10, %v1848_v11 }
 0xaf8   : > { %v2558_v16 = vpop.eup %2557 }
 0xaf9   : > { %v1864_v17 = vadd.f32 %v2157_v14, %v1856_v15  ;;  %v1849_v20 = vmul.f32 %v2558_v16, %v1835_v3 }
 0xafb   : > { %v1857_v21 = vmul.f32 %v2156_v10, %v1849_v20  ;;  %1866 = vst [vmem:[%s632_s27] sm:$0xff] %v1864_v17 }
 0xafd   : > { %v1865_v22 = vadd.f32 %v2157_v14, %v1857_v21 }
 0xaff   : > { %1867 = vst [vmem:[%s632_s27 + $0x8] sm:$0xff] %v1865_v22 }
 0xb00   : > { %2808 = shalt.err (!%p2805_p8)
}
 0xb01   : > { %s2809_s6 = scalar_lea.hbm %s3451_s5, 256  ;;  %s2813_s22 = scalar_lea.hbm %s3555_s3, 512 }
 0xb02   : > { %p2810_p11 = scmp.ne.s32.totalorder %s3451_s5, %s2809_s6  ;;  %p2814_p13 = scmp.lt.s32.totalorder %s3451_s5, %s3555_s3 }
 0xb03   : > { %p2815_p0 = scmp.lt.s32.totalorder %s2813_s22, %s2809_s6 }
 0xb04   : > { %p2811_p12 = pnand %p2810_p11, %p3556_p9 }
 0xb05   : > { %p2816_p2 = por %p2815_p0, %p2814_p13 }
 0xb06   : > { %p2812_p10 = pneg %p2811_p12 }
 0xb08   : > { %p2817_p4 = pnand %p2816_p2, %p2812_p10 }
 0xb0a   : > { %2820 = shalt.err (!%p2817_p4)
}
 0xb0b   : > { %s2897_s25 = smov 128   ;;  %s2898_s10 = smov 8  }
 0xb0c   : > { %2316 = dma.vmem_to_hbm [thread:$0]  (%p3556_p9), %s3453_s16, 256, %s3451_s5, %s1869_s7, %s2897_s25, %s2897_s25, %s2898_s10  }
 0xb0d PF: > { %s1897_s11 = sand.u32 1, %s2863_s18   ;;  %p3557_p7 = scmp.ne.s32.totalorder %s3540_s17, 0 }
 0xb0e   : > { %p3558_p3 = scmp.ge.s32.totalorder %s2875_s21, 2  ;;  %s1898_s6 = scalar_lea.sflag [#allocation4], %s1897_s11 }
 0xb10   : > { %p2348_p6 = pnand %p3558_p3, %p3557_p7 }
 0xb12   : > { %p2349_p5 = pneg %p2348_p6 }
 0xb14   : > { %2858 = dma.done.wait (%p2349_p5), %s1898_s6, 256  }
 0xb15   : > { %2860 = vsyncadd (%p2349_p5), %s1898_s6, 4294967040  ;;  %p32_p1 = scmp.ge.s32.totalorder %s3089_s28, 4   ;;  %s3559_s18 = smov %s2867_s19 }
 0xb16   : > { %s3560_s19 = smov %s2871_s20  ;;  %s3561_s20 = smov %s3100_s23 }
 0xb17   : > { %s3562_s21 = smov %s3089_s28  ;;  %34 = sbr.rel (!%p32_p1) target bundleno = 19 (0x13), region = 160 }
 0xb1c   :  { %1903 = vsyncpa [#allocation3], 1 }
 0xb1d   :  { %1905 = vsyncpa [#allocation3 + $0x1], 1 }
 0xb1e   :  { %1906 = vsyncpa [#allocation6], 1 }
 0xb1f   :  { %1907 = vsyncpa [#allocation9], 1 }
 0xb20   :  { %1908 = vsyncpa [#allocation12], 1 }
 0xb21   :  { %1909 = vsyncpa [#allocation15], 1 }
 0xb22   :  { %1910 = vsyncpa [#allocation4], 1 }
 0xb23   :  { %1912 = vsyncpa [#allocation4 + $0x1], 1 }

</bundles_post_ra>
